<compile_context>
chip_gen: v5e
topology: v5e:2x2
jax: 0.10.0
libtpu: 0.0.40
codegen_flags: <defaults>
</compile_context>

<pallas_src>
import jax
import jax.numpy as jnp
from jax import lax
from jax.experimental import pallas as pl
from jax.experimental.pallas import tpu as pltpu

F32 = jnp.float32
BF16 = jnp.bfloat16
NEG_BIG = -1e30          # finite stand-in for -inf in segment max
BN_EPS = 1e-5            # nn.BatchNorm1d default eps
LRELU_SLOPE = 0.01       # nn.LeakyReLU default negative_slope
W_CLAMP = 1e-30          # guards log(0); w**pow computed as exp(pow*log(w))


def _leaky_relu(x):
    return jnp.where(x > 0, x, LRELU_SLOPE * x)


def _dot(a, b):
    return jnp.dot(a, b, preferred_element_type=F32)


def _gather_rows(onehot_bf16, vals):
    # onehot (R, S) bf16 0/1, vals (S, K): picks vals[idx] row-wise on the MXU.
    return jnp.dot(onehot_bf16, vals.astype(BF16), preferred_element_type=F32)


def _scatter_add(onehot_bf16, vals):
    # onehot (R, S) bf16 0/1, vals (R, K): per-segment sum (S, K), f32 accumulation.
    return lax.dot_general(onehot_bf16, vals.astype(BF16),
                           (((0,), (0,)), ((), ())), preferred_element_type=F32)


def _segment_softmax(onehot_bf16, gate, log_w, pow_row):
    """Weighted per-segment softmax for all heads at once.

    onehot : (R, S) bf16 0/1 segment-membership matrix
    gate   : (R, H) f32 raw gate logits (all heads stacked)
    log_w  : (R, 1) f32 log of clamped fractional weights (precomputed, hoisted)
    pow_row: (1, H) f32 per-head pow parameter
    """
    n_heads = gate.shape[1]
    mask = onehot_bf16 > 0.5
    rows = []
    for h in range(n_heads):                                   # static unroll, H small
        masked = jnp.where(mask, gate[:, h:h + 1], NEG_BIG)    # (R, S)
        rows.append(jnp.max(masked, axis=0, keepdims=True))    # (1, S)
    seg_max = jnp.transpose(jnp.concatenate(rows, axis=0))     # (S, H)
    # single lane-width-H gather for all heads (replaces H narrow matmuls + selects)
    edge_max = _gather_rows(onehot_bf16, seg_max)              # (R, H)
    # w**pow * exp(gate - seg_max): one fused EUP exp per element
    gate_exp = jnp.exp(pow_row * log_w + gate - edge_max)      # (R, H)
    seg_sum = _scatter_add(onehot_bf16, gate_exp)              # (S, H)
    den = _gather_rows(onehot_bf16, seg_sum)                   # (R, H)
    return gate_exp * pl.reciprocal(den + 1e-10, approx=True)


# ---------------------------------------------------------------------------
# Fused kernel: embedding -> n_graph MessageLayers (+BN) -> crystal pooling
# ---------------------------------------------------------------------------

def descriptor_kernel(raw_ref, embw_ref, embb_ref, wts_ref,
                      logw_nbr_ref, logw_node_ref,
                      self_oh_ref, nbr_oh_ref, cry_oh_ref,
                      ebcast_ref, emean_ref,
                      cw0_ref, cb0_ref, cgw1_ref, cgb1_ref, cmw1_ref, cmb1_ref,
                      cpow_ref, cbcast_ref, cmean_ref,
                      w0_ref, b0_ref, gw1_ref, gb1_ref, mw1_ref, mb1_ref,
                      pow_ref, bng_ref, bnb_ref,
                      out_ref, fea_ref):
    layer = pl.program_id(0)
    n_layers = pl.num_programs(0)

    # ---- grid step 0: embedding Linear fused with cat([emb, elem_weights], 1) ----
    @pl.when(layer == 0)
    def _():
        emb = _dot(raw_ref[...], embw_ref[...]) + embb_ref[...]      # (N, F), last col 0
        f = emb.shape[1]
        col = lax.broadcasted_iota(jnp.int32, (1, f), 1)
        fea_ref[...] = emb + wts_ref[...] * (col == f - 1).astype(F32)
        out_ref[...] = jnp.zeros_like(out_ref)

    elem_fea = fea_ref[...]                      # (N, F) VMEM-resident carry
    fea_bf = elem_fea.astype(BF16)
    self_oh = self_oh_ref[...]                   # (M, N) bf16 0/1
    nbr_oh = nbr_oh_ref[...]                     # (M, N) bf16 0/1

    # index gathers expressed as native bf16 MXU matmuls (f32 accumulation)
    self_fea = jnp.dot(self_oh, fea_bf, preferred_element_type=F32)  # (M, F)
    nbr_fea = jnp.dot(nbr_oh, fea_bf, preferred_element_type=F32)    # (M, F)

    # ---- gate_nn + message_nn first layers fused into one lane-dense matmul ----
    w0 = w0_ref[0]                               # (2F, H*(Hg+Hm))
    half = w0.shape[0] // 2
    z = _leaky_relu(_dot(self_fea, w0[:half, :]) + _dot(nbr_fea, w0[half:, :])
                    + b0_ref[0])                 # (M, H*(Hg+Hm))
    gate = _dot(z, gw1_ref[0]) + gb1_ref[0]      # (M, H)   zero-padded block-diag W1
    msg = _dot(z, mw1_ref[0]) + mb1_ref[0]       # (M, H*F) zero-padded block-diag W1

    attn = _segment_softmax(self_oh, gate, logw_nbr_ref[...], pow_ref[0])   # (M, H)

    attn_b = _dot(attn, ebcast_ref[...])                             # (M, H*F)
    pooled = _scatter_add(self_oh, attn_b * msg)                     # (N, H*F)
    fea_new = _dot(pooled, emean_ref[...]) + elem_fea                # mean over heads + residual

    # BatchNorm1d with training-mode batch statistics (module default), biased var.
    mu = jnp.mean(fea_new, axis=0, keepdims=True)
    var = jnp.mean((fea_new - mu) ** 2, axis=0, keepdims=True)
    fea_bn = (fea_new - mu) * lax.rsqrt(var + BN_EPS) * bng_ref[0] + bnb_ref[0]
    fea_ref[...] = fea_bn

    # ---- last grid step: crystal-level weighted attention pooling (fused) ----
    @pl.when(layer == n_layers - 1)
    def _():
        zc = _leaky_relu(_dot(fea_bn, cw0_ref[...]) + cb0_ref[...])  # (N, Hc*(Cg+Cm))
        gate_c = _dot(zc, cgw1_ref[...]) + cgb1_ref[...]             # (N, Hc)
        msg_c = _dot(zc, cmw1_ref[...]) + cmb1_ref[...]              # (N, Hc*F)
        attn_c = _segment_softmax(cry_oh_ref[...], gate_c,
                                  logw_node_ref[...], cpow_ref[...])  # (N, Hc)
        attn_bc = _dot(attn_c, cbcast_ref[...])                      # (N, Hc*F)
        pooled_c = _scatter_add(cry_oh_ref[...], attn_bc * msg_c)    # (C, Hc*F)
        out_ref[...] = _dot(pooled_c, cmean_ref[...])                # (C, F)


# ---------------------------------------------------------------------------
# Wrapper
# ---------------------------------------------------------------------------

def _vmem_limit_bytes():
    cap = 64 * 1024 * 1024                       # conservative fallback (v7x)
    try:
        cap = int(pltpu.get_tpu_info().vmem_capacity_bytes)
    except Exception:
        pass
    # headroom for pipeline double buffers + Mosaic internal scratch
    return max(32 * 1024 * 1024, min(int(cap * 0.85), 110 * 1024 * 1024))


def descriptor_network_forward(params, elem_weights, elem_fea,
                               self_fea_idx, nbr_fea_idx, cry_elem_idx,
                               *, n_crystals, elem_fea_len):
    n = elem_fea.shape[0]
    m = self_fea_idx.shape[0]
    f = elem_fea_len
    graphs = params['graphs']
    cry = params['cry']
    n_graph = graphs['w0'].shape[0]

    # TODO(synk): replace dense one-hots with index-driven gathers (scalar-prefetch
    # index_maps / DMA row gathers + edge-tiled grid) for realistic Roost sizes.
    self_oh = jax.nn.one_hot(self_fea_idx, n, dtype=BF16)            # (M, N)
    nbr_oh = jax.nn.one_hot(nbr_fea_idx, n, dtype=BF16)              # (M, N)
    cry_oh = jax.nn.one_hot(cry_elem_idx, n_crystals, dtype=BF16)    # (N, C)

    # O(N)/O(M) layer-invariant precompute in plain XLA (hoisted out of every layer).
    logw_node = jnp.log(jnp.maximum(elem_weights, W_CLAMP))          # (N, 1)
    logw_nbr = jnp.take(logw_node, nbr_fea_idx, axis=0)              # (M, 1)

    def const_spec(a):
        nd = a.ndim
        return pl.BlockSpec(a.shape, lambda l: (0,) * nd)

    def layer_spec(a):
        _, r, c = a.shape
        return pl.BlockSpec((1, r, c), lambda l: (l, 0, 0))

    const_ops = [elem_fea, params['emb_w_pad'], params['emb_b_pad'], elem_weights,
                 logw_nbr, logw_node, self_oh, nbr_oh, cry_oh,
                 params['elem_bcast'], params['elem_mean'],
                 cry['w0'], cry['b0'], cry['gw1'], cry['gb1'], cry['mw1'],
                 cry['mb1'], cry['pow'], params['cry_bcast'], params['cry_mean']]
    layer_ops = [graphs['w0'], graphs['b0'], graphs['gw1'], graphs['gb1'],
                 graphs['mw1'], graphs['mb1'], graphs['pow'],
                 graphs['bn_gamma'], graphs['bn_beta']]
    in_specs = [const_spec(a) for a in const_ops] + [layer_spec(a) for a in layer_ops]

    h = graphs['gw1'].shape[2]
    hf = graphs['mw1'].shape[2]
    k0 = graphs['w0'].shape[2]
    hc = cry['gw1'].shape[1]
    kc0 = cry['w0'].shape[1]
    flops_layer = (2 * m * n * (2 * f + 3 * h + hf)
                   + 2 * m * (2 * f) * k0 + 2 * m * k0 * (h + hf)
                   + 2 * m * h * hf + 2 * n * hf * f + 8 * n * f)
    flops_cry = (2 * n * f * kc0 + 2 * n * kc0 * (hc + hc * f)
                 + 2 * n * n_crystals * (3 * hc + hc * f)
                 + 2 * n_crystals * hc * f * f)
    cost = pl.CostEstimate(
        flops=int(n_graph * flops_layer + flops_cry + 2 * n * elem_fea.shape[1] * f),
        transcendentals=int(n_graph * m * h + n * hc),
        bytes_accessed=int(sum(int(a.size) * a.dtype.itemsize
                               for a in const_ops + layer_ops) + 4 * n_crystals * f))

    return pl.pallas_call(
        descriptor_kernel,
        out_shape=jax.ShapeDtypeStruct((n_crystals, f), F32),
        grid=(n_graph,),
        in_specs=in_specs,
        out_specs=pl.BlockSpec((n_crystals, f), lambda l: (0, 0)),
        scratch_shapes=[pltpu.VMEM((n, f), F32)],                    # resident fea carry
        compiler_params=pltpu.CompilerParams(
            dimension_semantics=("arbitrary",),   # layers are sequentially dependent
            vmem_limit_bytes=_vmem_limit_bytes()),
        cost_estimate=cost,
    )(*const_ops, *layer_ops)
    # TODO(synk): per-head attention coefficients (gate_list) are not returned.


# ---------------------------------------------------------------------------
# Deterministic parameter init + head packing
# ---------------------------------------------------------------------------

def _linear(key, din, dout, xavier=False):
    kw, kb = jax.random.split(key)
    if xavier:
        lim = (6.0 / (din + dout)) ** 0.5
        w = jax.random.uniform(kw, (din, dout), F32, -lim, lim)
        b = jnp.zeros((1, dout), F32)
    else:
        lim = 1.0 / (din ** 0.5)
        w = jax.random.uniform(kw, (din, dout), F32, -lim, lim)
        b = jax.random.uniform(kb, (1, dout), F32, -lim, lim)
    return w, b


def _attn_head(key, fea_in, fea_out, hidden_gate, hidden_msg):
    k = jax.random.split(key, 5)
    gw0, gb0 = _linear(k[0], fea_in, hidden_gate)
    gw1, gb1 = _linear(k[1], hidden_gate, 1)
    mw0, mb0 = _linear(k[2], fea_in, hidden_msg)
    mw1, mb1 = _linear(k[3], hidden_msg, fea_out)
    powp = jax.random.normal(k[4], (1, 1), F32)
    return dict(gw0=gw0, gb0=gb0, gw1=gw1, gb1=gb1,
                mw0=mw0, mb0=mb0, mw1=mw1, mb1=mb1, pow=powp)


def _block_diag(mats):
    a, b = mats[0].shape
    out = jnp.zeros((len(mats) * a, len(mats) * b), F32)
    for i, mat in enumerate(mats):
        out = out.at[i * a:(i + 1) * a, i * b:(i + 1) * b].set(mat)
    return out


def _pack_heads(heads):
    """Pack per-head gate/message MLPs into one fused lane-dense matmul chain."""
    n_heads = len(heads)
    hg = heads[0]['gw0'].shape[1]
    hm = heads[0]['mw0'].shape[1]
    fout = heads[0]['mw1'].shape[1]
    w0 = jnp.concatenate([h['gw0'] for h in heads] + [h['mw0'] for h in heads], axis=1)
    b0 = jnp.concatenate([h['gb0'] for h in heads] + [h['mb0'] for h in heads], axis=1)
    gw1 = jnp.concatenate([_block_diag([h['gw1'] for h in heads]),
                           jnp.zeros((n_heads * hm, n_heads), F32)], axis=0)
    mw1 = jnp.concatenate([jnp.zeros((n_heads * hg, n_heads * fout), F32),
                           _block_diag([h['mw1'] for h in heads])], axis=0)
    gb1 = jnp.concatenate([h['gb1'] for h in heads], axis=1)
    mb1 = jnp.concatenate([h['mb1'] for h in heads], axis=1)
    powp = jnp.concatenate([h['pow'] for h in heads], axis=1)
    return dict(w0=w0, b0=b0, gw1=gw1, gb1=gb1, mw1=mw1, mb1=mb1, pow=powp)


def _head_broadcast_mats(n_heads, fea_len):
    # attn (*, H) @ bcast -> (*, H*F): broadcast each head's coefficient over F cols
    bcast = jnp.kron(jnp.eye(n_heads, dtype=F32), jnp.ones((1, fea_len), F32))
    # pooled (*, H*F) @ mean -> (*, F): exact mean over heads on the MXU
    meanm = jnp.kron(jnp.ones((n_heads, 1), F32),
                     jnp.eye(fea_len, dtype=F32)) / n_heads
    return bcast, meanm


def init_params(key, elem_emb_len, elem_fea_len, n_graph,
                elem_heads, hg, hm, cry_heads, cg, cm):
    keys = iter(jax.random.split(key, 1 + n_graph * elem_heads + cry_heads))
    emb_w, emb_b = _linear(next(keys), elem_emb_len, elem_fea_len - 1, xavier=True)
    # zero-pad to F columns; kernel fills the last column with fractional weights
    emb_w_pad = jnp.concatenate([emb_w, jnp.zeros((elem_emb_len, 1), F32)], axis=1)
    emb_b_pad = jnp.concatenate([emb_b, jnp.zeros((1, 1), F32)], axis=1)

    layers = []
    for _ in range(n_graph):
        heads = [_attn_head(next(keys), 2 * elem_fea_len, elem_fea_len, hg, hm)
                 for _ in range(elem_heads)]
        layer = _pack_heads(heads)
        layer['bn_gamma'] = jnp.ones((1, elem_fea_len), F32)
        layer['bn_beta'] = jnp.zeros((1, elem_fea_len), F32)
        layers.append(layer)
    graphs = {k: jnp.stack([lyr[k] for lyr in layers]) for k in layers[0]}

    cry_head_params = [_attn_head(next(keys), elem_fea_len, elem_fea_len, cg, cm)
                       for _ in range(cry_heads)]
    cry = _pack_heads(cry_head_params)

    elem_bcast, elem_mean = _head_broadcast_mats(elem_heads, elem_fea_len)
    cry_bcast, cry_mean = _head_broadcast_mats(cry_heads, elem_fea_len)
    return dict(emb_w_pad=emb_w_pad, emb_b_pad=emb_b_pad, graphs=graphs, cry=cry,
                elem_bcast=elem_bcast, elem_mean=elem_mean,
                cry_bcast=cry_bcast, cry_mean=cry_mean)


# ---------------------------------------------------------------------------
# Main
# ---------------------------------------------------------------------------

if __name__ == "__main__":
    ELEM_EMB_LEN = 16
    ELEM_FEA_LEN = 16
    N_GRAPH = 2
    ELEM_HEADS = 2
    CRY_HEADS = 2
    HG = HM = CG = CM = 32

    C = 3                       # crystals
    ELEMS_PER_CRYSTAL = 4
    N = C * ELEMS_PER_CRYSTAL   # nodes
    # fully-connected (incl. self) edges within each crystal
    self_idx, nbr_idx, cry_idx = [], [], []
    for c in range(C):
        base = c * ELEMS_PER_CRYSTAL
        for i in range(ELEMS_PER_CRYSTAL):
            cry_idx.append(c)
            for j in range(ELEMS_PER_CRYSTAL):
                self_idx.append(base + i)
                nbr_idx.append(base + j)
    self_fea_idx = jnp.asarray(self_idx, jnp.int32)    # (M,)
    nbr_fea_idx = jnp.asarray(nbr_idx, jnp.int32)      # (M,)
    cry_elem_idx = jnp.asarray(cry_idx, jnp.int32)     # (N,)

    key = jax.random.PRNGKey(0)
    k_fea, k_w, k_p = jax.random.split(key, 3)
    elem_fea = jax.random.normal(k_fea, (N, ELEM_EMB_LEN), F32)
    raw_w = jax.random.uniform(k_w, (C, ELEMS_PER_CRYSTAL), F32, 0.1, 1.0)
    elem_weights = (raw_w / raw_w.sum(axis=1, keepdims=True)).reshape(N, 1)

    params = init_params(k_p, ELEM_EMB_LEN, ELEM_FEA_LEN, N_GRAPH,
                         ELEM_HEADS, HG, HM, CRY_HEADS, CG, CM)

    cry_fea = descriptor_network_forward(
        params, elem_weights, elem_fea, self_fea_idx, nbr_fea_idx, cry_elem_idx,
        n_crystals=C, elem_fea_len=ELEM_FEA_LEN)
    cry_fea = jax.block_until_ready(cry_fea)

    assert cry_fea.shape == (C, ELEM_FEA_LEN)
    assert bool(jnp.isfinite(cry_fea).all())
    print("KERNEL_OK")
</pallas_src>

<mosaic_0001>
module attributes {stable_mosaic.version = 11 : i64} {
  func.func @descriptor_kernel(%arg0: i32, %arg1: memref<12x16xf32, #tpu.memory_space<vmem>>, %arg2: memref<16x16xf32, #tpu.memory_space<vmem>>, %arg3: memref<1x16xf32, #tpu.memory_space<vmem>>, %arg4: memref<12x1xf32, #tpu.memory_space<vmem>>, %arg5: memref<48x1xf32, #tpu.memory_space<vmem>>, %arg6: memref<12x1xf32, #tpu.memory_space<vmem>>, %arg7: memref<48x12xbf16, #tpu.memory_space<vmem>>, %arg8: memref<48x12xbf16, #tpu.memory_space<vmem>>, %arg9: memref<12x3xbf16, #tpu.memory_space<vmem>>, %arg10: memref<2x32xf32, #tpu.memory_space<vmem>>, %arg11: memref<32x16xf32, #tpu.memory_space<vmem>>, %arg12: memref<16x128xf32, #tpu.memory_space<vmem>>, %arg13: memref<1x128xf32, #tpu.memory_space<vmem>>, %arg14: memref<128x2xf32, #tpu.memory_space<vmem>>, %arg15: memref<1x2xf32, #tpu.memory_space<vmem>>, %arg16: memref<128x32xf32, #tpu.memory_space<vmem>>, %arg17: memref<1x32xf32, #tpu.memory_space<vmem>>, %arg18: memref<1x2xf32, #tpu.memory_space<vmem>>, %arg19: memref<2x32xf32, #tpu.memory_space<vmem>>, %arg20: memref<32x16xf32, #tpu.memory_space<vmem>>, %arg21: memref<1x32x128xf32, #tpu.memory_space<vmem>>, %arg22: memref<1x1x128xf32, #tpu.memory_space<vmem>>, %arg23: memref<1x128x2xf32, #tpu.memory_space<vmem>>, %arg24: memref<1x1x2xf32, #tpu.memory_space<vmem>>, %arg25: memref<1x128x32xf32, #tpu.memory_space<vmem>>, %arg26: memref<1x1x32xf32, #tpu.memory_space<vmem>>, %arg27: memref<1x1x2xf32, #tpu.memory_space<vmem>>, %arg28: memref<1x1x16xf32, #tpu.memory_space<vmem>>, %arg29: memref<1x1x16xf32, #tpu.memory_space<vmem>>, %arg30: memref<3x16xf32, #tpu.memory_space<vmem>>, %arg31: memref<12x16xf32, #tpu.memory_space<vmem>>) attributes {dimension_semantics = [#tpu.dimension_semantics<arbitrary>], iteration_bounds = array<i64: 2>, scalar_prefetch = 0 : i64, scratch_operands = 1 : i64, tpu.core_type = #tpu.core_type<tc>, window_params = [{pipeline_mode = #tpu.pipeline_mode<synchronous>, transform_indices = @transform_0, window_bounds = array<i64: 12, 16>}, {pipeline_mode = #tpu.pipeline_mode<synchronous>, transform_indices = @transform_1, window_bounds = array<i64: 16, 16>}, {pipeline_mode = #tpu.pipeline_mode<synchronous>, transform_indices = @transform_2, window_bounds = array<i64: 1, 16>}, {pipeline_mode = #tpu.pipeline_mode<synchronous>, transform_indices = @transform_3, window_bounds = array<i64: 12, 1>}, {pipeline_mode = #tpu.pipeline_mode<synchronous>, transform_indices = @transform_4, window_bounds = array<i64: 48, 1>}, {pipeline_mode = #tpu.pipeline_mode<synchronous>, transform_indices = @transform_5, window_bounds = array<i64: 12, 1>}, {pipeline_mode = #tpu.pipeline_mode<synchronous>, transform_indices = @transform_6, window_bounds = array<i64: 48, 12>}, {pipeline_mode = #tpu.pipeline_mode<synchronous>, transform_indices = @transform_7, window_bounds = array<i64: 48, 12>}, {pipeline_mode = #tpu.pipeline_mode<synchronous>, transform_indices = @transform_8, window_bounds = array<i64: 12, 3>}, {pipeline_mode = #tpu.pipeline_mode<synchronous>, transform_indices = @transform_9, window_bounds = array<i64: 2, 32>}, {pipeline_mode = #tpu.pipeline_mode<synchronous>, transform_indices = @transform_10, window_bounds = array<i64: 32, 16>}, {pipeline_mode = #tpu.pipeline_mode<synchronous>, transform_indices = @transform_11, window_bounds = array<i64: 16, 128>}, {pipeline_mode = #tpu.pipeline_mode<synchronous>, transform_indices = @transform_12, window_bounds = array<i64: 1, 128>}, {pipeline_mode = #tpu.pipeline_mode<synchronous>, transform_indices = @transform_13, window_bounds = array<i64: 128, 2>}, {pipeline_mode = #tpu.pipeline_mode<synchronous>, transform_indices = @transform_14, window_bounds = array<i64: 1, 2>}, {pipeline_mode = #tpu.pipeline_mode<synchronous>, transform_indices = @transform_15, window_bounds = array<i64: 128, 32>}, {pipeline_mode = #tpu.pipeline_mode<synchronous>, transform_indices = @transform_16, window_bounds = array<i64: 1, 32>}, {pipeline_mode = #tpu.pipeline_mode<synchronous>, transform_indices = @transform_17, window_bounds = array<i64: 1, 2>}, {pipeline_mode = #tpu.pipeline_mode<synchronous>, transform_indices = @transform_18, window_bounds = array<i64: 2, 32>}, {pipeline_mode = #tpu.pipeline_mode<synchronous>, transform_indices = @transform_19, window_bounds = array<i64: 32, 16>}, {transform_indices = @transform_20, window_bounds = array<i64: 1, 32, 128>}, {transform_indices = @transform_21, window_bounds = array<i64: 1, 1, 128>}, {transform_indices = @transform_22, window_bounds = array<i64: 1, 128, 2>}, {transform_indices = @transform_23, window_bounds = array<i64: 1, 1, 2>}, {transform_indices = @transform_24, window_bounds = array<i64: 1, 128, 32>}, {transform_indices = @transform_25, window_bounds = array<i64: 1, 1, 32>}, {transform_indices = @transform_26, window_bounds = array<i64: 1, 1, 2>}, {transform_indices = @transform_27, window_bounds = array<i64: 1, 1, 16>}, {transform_indices = @transform_28, window_bounds = array<i64: 1, 1, 16>}, {pipeline_mode = #tpu.pipeline_mode<synchronous>, transform_indices = @transform_29, window_bounds = array<i64: 3, 16>}]} {
    %c0_i32 = arith.constant 0 : i32
    %0 = arith.cmpi eq, %arg0, %c0_i32 : i32
    %1 = arith.extui %0 : i1 to i32
    %c0_i32_0 = arith.constant 0 : i32
    %2 = arith.cmpi ne, %1, %c0_i32_0 : i32
    scf.if %2 {
      %c0_66 = arith.constant 0 : index
      %c0_67 = arith.constant 0 : index
      %114 = vector.load %arg1[%c0_66, %c0_67] : memref<12x16xf32, #tpu.memory_space<vmem>>, vector<12x16xf32>
      %c0_68 = arith.constant 0 : index
      %c0_69 = arith.constant 0 : index
      %115 = vector.load %arg2[%c0_68, %c0_69] : memref<16x16xf32, #tpu.memory_space<vmem>>, vector<16x16xf32>
      %cst_70 = arith.constant dense<0.000000e+00> : vector<12x16xf32>
      %116 = tpu.matmul %114, %115, %cst_70 {dimension_numbers = #tpu.dot_dimension_numbers<[1], [0], [0], [1], [0, 0, 1, 1], [], []>} : vector<12x16xf32>, vector<16x16xf32>, vector<12x16xf32> -> vector<12x16xf32>
      %c0_71 = arith.constant 0 : index
      %c0_72 = arith.constant 0 : index
      %117 = vector.load %arg3[%c0_71, %c0_72] : memref<1x16xf32, #tpu.memory_space<vmem>>, vector<1x16xf32>
      %118 = vector.broadcast %117 : vector<1x16xf32> to vector<12x16xf32>
      %119 = arith.addf %116, %118 : vector<12x16xf32>
      %120 = tpu.iota {dimensions = array<i32: 1>} : vector<1x16xi32>
      %c0_73 = arith.constant 0 : index
      %c0_74 = arith.constant 0 : index
      %121 = vector.load %arg4[%c0_73, %c0_74] : memref<12x1xf32, #tpu.memory_space<vmem>>, vector<12x1xf32>
      %c15_i32 = arith.constant 15 : i32
      %122 = vector.broadcast %c15_i32 : i32 to vector<1x16xi32>
      %123 = arith.cmpi eq, %120, %122 : vector<1x16xi32>
      %124 = arith.extui %123 : vector<1x16xi1> to vector<1x16xi32>
      %125 = arith.sitofp %124 : vector<1x16xi32> to vector<1x16xf32>
      %126 = vector.broadcast %121 : vector<12x1xf32> to vector<12x16xf32>
      %127 = vector.broadcast %125 : vector<1x16xf32> to vector<12x16xf32>
      %128 = arith.mulf %126, %127 : vector<12x16xf32>
      %129 = arith.addf %119, %128 : vector<12x16xf32>
      %c0_75 = arith.constant 0 : index
      %c0_76 = arith.constant 0 : index
      %130 = vector.load %arg31[%c0_75, %c0_76] : memref<12x16xf32, #tpu.memory_space<vmem>>, vector<12x16xf32>
      tpu.vector_store %arg31[%c0_75, %c0_76], %129 {strides = array<i32>} : memref<12x16xf32, #tpu.memory_space<vmem>>, vector<12x16xf32>,
      %cst_77 = arith.constant 0.000000e+00 : f32
      %131 = vector.broadcast %cst_77 : f32 to vector<3x16xf32>
      %c0_78 = arith.constant 0 : index
      %c0_79 = arith.constant 0 : index
      %132 = vector.load %arg30[%c0_78, %c0_79] : memref<3x16xf32, #tpu.memory_space<vmem>>, vector<3x16xf32>
      tpu.vector_store %arg30[%c0_78, %c0_79], %131 {strides = array<i32>} : memref<3x16xf32, #tpu.memory_space<vmem>>, vector<3x16xf32>,
    } else {
    }
    %c0 = arith.constant 0 : index
    %c0_1 = arith.constant 0 : index
    %3 = vector.load %arg31[%c0, %c0_1] : memref<12x16xf32, #tpu.memory_space<vmem>>, vector<12x16xf32>
    %4 = arith.truncf %3 : vector<12x16xf32> to vector<12x16xbf16>
    %c0_2 = arith.constant 0 : index
    %c0_3 = arith.constant 0 : index
    %5 = vector.load %arg7[%c0_2, %c0_3] : memref<48x12xbf16, #tpu.memory_space<vmem>>, vector<48x12xbf16>
    %c0_4 = arith.constant 0 : index
    %c0_5 = arith.constant 0 : index
    %6 = vector.load %arg8[%c0_4, %c0_5] : memref<48x12xbf16, #tpu.memory_space<vmem>>, vector<48x12xbf16>
    %cst = arith.constant dense<0.000000e+00> : vector<48x16xf32>
    %7 = tpu.matmul %5, %4, %cst {dimension_numbers = #tpu.dot_dimension_numbers<[1], [0], [0], [1], [0, 0, 1, 1], [], []>} : vector<48x12xbf16>, vector<12x16xbf16>, vector<48x16xf32> -> vector<48x16xf32>
    %cst_6 = arith.constant dense<0.000000e+00> : vector<48x16xf32>
    %8 = tpu.matmul %6, %4, %cst_6 {dimension_numbers = #tpu.dot_dimension_numbers<[1], [0], [0], [1], [0, 0, 1, 1], [], []>} : vector<48x12xbf16>, vector<12x16xbf16>, vector<48x16xf32> -> vector<48x16xf32>
    %c0_7 = arith.constant 0 : index
    %c0_8 = arith.constant 0 : index
    %c0_9 = arith.constant 0 : index
    %9 = vector.load %arg21[%c0_7, %c0_8, %c0_9] : memref<1x32x128xf32, #tpu.memory_space<vmem>>, vector<1x32x128xf32>
    %10 = vector.shape_cast %9 : vector<1x32x128xf32> to vector<32x128xf32>
    %11 = vector.extract_strided_slice %10 {offsets = [0, 0], sizes = [16, 128], strides = [1, 1]} : vector<32x128xf32> to vector<16x128xf32>
    %cst_10 = arith.constant dense<0.000000e+00> : vector<48x128xf32>
    %12 = tpu.matmul %7, %11, %cst_10 {dimension_numbers = #tpu.dot_dimension_numbers<[1], [0], [0], [1], [0, 0, 1, 1], [], []>} : vector<48x16xf32>, vector<16x128xf32>, vector<48x128xf32> -> vector<48x128xf32>
    %13 = vector.extract_strided_slice %10 {offsets = [16, 0], sizes = [16, 128], strides = [1, 1]} : vector<32x128xf32> to vector<16x128xf32>
    %cst_11 = arith.constant dense<0.000000e+00> : vector<48x128xf32>
    %14 = tpu.matmul %8, %13, %cst_11 {dimension_numbers = #tpu.dot_dimension_numbers<[1], [0], [0], [1], [0, 0, 1, 1], [], []>} : vector<48x16xf32>, vector<16x128xf32>, vector<48x128xf32> -> vector<48x128xf32>
    %15 = arith.addf %12, %14 : vector<48x128xf32>
    %c0_12 = arith.constant 0 : index
    %c0_13 = arith.constant 0 : index
    %c0_14 = arith.constant 0 : index
    %16 = vector.load %arg22[%c0_12, %c0_13, %c0_14] : memref<1x1x128xf32, #tpu.memory_space<vmem>>, vector<1x1x128xf32>
    %17 = vector.shape_cast %16 : vector<1x1x128xf32> to vector<1x128xf32>
    %18 = vector.broadcast %17 : vector<1x128xf32> to vector<48x128xf32>
    %19 = arith.addf %15, %18 : vector<48x128xf32>
    %cst_15 = arith.constant 0.000000e+00 : f32
    %20 = vector.broadcast %cst_15 : f32 to vector<48x128xf32>
    %21 = arith.cmpf ogt, %19, %20 : vector<48x128xf32>
    %cst_16 = arith.constant 0.00999999977 : f32
    %22 = vector.broadcast %cst_16 : f32 to vector<48x128xf32>
    %23 = arith.mulf %22, %19 : vector<48x128xf32>
    %24 = arith.select %21, %19, %23 : vector<48x128xi1>, vector<48x128xf32>
    %c0_17 = arith.constant 0 : index
    %c0_18 = arith.constant 0 : index
    %c0_19 = arith.constant 0 : index
    %25 = vector.load %arg23[%c0_17, %c0_18, %c0_19] : memref<1x128x2xf32, #tpu.memory_space<vmem>>, vector<1x128x2xf32>
    %26 = vector.shape_cast %25 : vector<1x128x2xf32> to vector<128x2xf32>
    %cst_20 = arith.constant dense<0.000000e+00> : vector<48x2xf32>
    %27 = tpu.matmul %24, %26, %cst_20 {dimension_numbers = #tpu.dot_dimension_numbers<[1], [0], [0], [1], [0, 0, 1, 1], [], []>} : vector<48x128xf32>, vector<128x2xf32>, vector<48x2xf32> -> vector<48x2xf32>
    %c0_21 = arith.constant 0 : index
    %c0_22 = arith.constant 0 : index
    %c0_23 = arith.constant 0 : index
    %28 = vector.load %arg24[%c0_21, %c0_22, %c0_23] : memref<1x1x2xf32, #tpu.memory_space<vmem>>, vector<1x1x2xf32>
    %29 = vector.shape_cast %28 : vector<1x1x2xf32> to vector<1x2xf32>
    %30 = vector.broadcast %29 : vector<1x2xf32> to vector<48x2xf32>
    %31 = arith.addf %27, %30 : vector<48x2xf32>
    %c0_24 = arith.constant 0 : index
    %c0_25 = arith.constant 0 : index
    %c0_26 = arith.constant 0 : index
    %32 = vector.load %arg25[%c0_24, %c0_25, %c0_26] : memref<1x128x32xf32, #tpu.memory_space<vmem>>, vector<1x128x32xf32>
    %33 = vector.shape_cast %32 : vector<1x128x32xf32> to vector<128x32xf32>
    %cst_27 = arith.constant dense<0.000000e+00> : vector<48x32xf32>
    %34 = tpu.matmul %24, %33, %cst_27 {dimension_numbers = #tpu.dot_dimension_numbers<[1], [0], [0], [1], [0, 0, 1, 1], [], []>} : vector<48x128xf32>, vector<128x32xf32>, vector<48x32xf32> -> vector<48x32xf32>
    %c0_28 = arith.constant 0 : index
    %c0_29 = arith.constant 0 : index
    %c0_30 = arith.constant 0 : index
    %35 = vector.load %arg26[%c0_28, %c0_29, %c0_30] : memref<1x1x32xf32, #tpu.memory_space<vmem>>, vector<1x1x32xf32>
    %36 = vector.shape_cast %35 : vector<1x1x32xf32> to vector<1x32xf32>
    %37 = vector.broadcast %36 : vector<1x32xf32> to vector<48x32xf32>
    %38 = arith.addf %34, %37 : vector<48x32xf32>
    %c0_31 = arith.constant 0 : index
    %c0_32 = arith.constant 0 : index
    %39 = vector.load %arg5[%c0_31, %c0_32] : memref<48x1xf32, #tpu.memory_space<vmem>>, vector<48x1xf32>
    %c0_33 = arith.constant 0 : index
    %c0_34 = arith.constant 0 : index
    %c0_35 = arith.constant 0 : index
    %40 = vector.load %arg27[%c0_33, %c0_34, %c0_35] : memref<1x1x2xf32, #tpu.memory_space<vmem>>, vector<1x1x2xf32>
    %41 = vector.shape_cast %40 : vector<1x1x2xf32> to vector<1x2xf32>
    %cst_36 = arith.constant 5.000000e-01 : bf16
    %42 = vector.broadcast %cst_36 : bf16 to vector<48x12xbf16>
    %43 = arith.cmpf ogt, %5, %42 : vector<48x12xbf16>
    %44 = vector.extract_strided_slice %31 {offsets = [0, 0], sizes = [48, 1], strides = [1, 1]} : vector<48x2xf32> to vector<48x1xf32>
    %cst_37 = arith.constant -1.000000e+30 : f32
    %45 = vector.shape_cast %44 : vector<48x1xf32> to vector<48x1xf32>
    %46 = vector.broadcast %45 : vector<48x1xf32> to vector<48x12xf32>
    %47 = vector.broadcast %cst_37 : f32 to vector<48x12xf32>
    %48 = arith.select %43, %46, %47 : vector<48x12xi1>, vector<48x12xf32>
    %cst_38 = arith.constant dense<0xFF800000> : vector<12xf32>
    %49 = vector.multi_reduction <maximumf>, %48, %cst_38 [0] : vector<48x12xf32> to vector<12xf32>
    %50 = vector.shape_cast %49 : vector<12xf32> to vector<1x12xf32>
    %51 = vector.extract_strided_slice %31 {offsets = [0, 1], sizes = [48, 1], strides = [1, 1]} : vector<48x2xf32> to vector<48x1xf32>
    %cst_39 = arith.constant -1.000000e+30 : f32
    %52 = vector.shape_cast %51 : vector<48x1xf32> to vector<48x1xf32>
    %53 = vector.broadcast %52 : vector<48x1xf32> to vector<48x12xf32>
    %54 = vector.broadcast %cst_39 : f32 to vector<48x12xf32>
    %55 = arith.select %43, %53, %54 : vector<48x12xi1>, vector<48x12xf32>
    %cst_40 = arith.constant dense<0xFF800000> : vector<12xf32>
    %56 = vector.multi_reduction <maximumf>, %55, %cst_40 [0] : vector<48x12xf32> to vector<12xf32>
    %57 = vector.shape_cast %56 : vector<12xf32> to vector<1x12xf32>
    %58 = tpu.concatenate %50, %57 in 0 : vector<1x12xf32>, vector<1x12xf32> -> vector<2x12xf32>
    %59 = tpu.transpose %58, [1, 0] : vector<2x12xf32> -> vector<12x2xf32>
    %60 = arith.truncf %59 : vector<12x2xf32> to vector<12x2xbf16>
    %cst_41 = arith.constant dense<0.000000e+00> : vector<48x2xf32>
    %61 = tpu.matmul %5, %60, %cst_41 {dimension_numbers = #tpu.dot_dimension_numbers<[1], [0], [0], [1], [0, 0, 1, 1], [], []>} : vector<48x12xbf16>, vector<12x2xbf16>, vector<48x2xf32> -> vector<48x2xf32>
    %62 = vector.broadcast %41 : vector<1x2xf32> to vector<48x2xf32>
    %63 = vector.broadcast %39 : vector<48x1xf32> to vector<48x2xf32>
    %64 = arith.mulf %62, %63 : vector<48x2xf32>
    %65 = arith.addf %64, %31 : vector<48x2xf32>
    %66 = arith.subf %65, %61 : vector<48x2xf32>
    %67 = math.exp %66 : vector<48x2xf32>
    %68 = arith.truncf %67 : vector<48x2xf32> to vector<48x2xbf16>
    %cst_42 = arith.constant dense<0.000000e+00> : vector<12x2xf32>
    %69 = tpu.matmul %5, %68, %cst_42 {dimension_numbers = #tpu.dot_dimension_numbers<[0], [0], [1], [1], [0, 1, 1, 1], [], []>} : vector<48x12xbf16>, vector<48x2xbf16>, vector<12x2xf32> -> vector<12x2xf32>
    %70 = arith.truncf %69 : vector<12x2xf32> to vector<12x2xbf16>
    %cst_43 = arith.constant dense<0.000000e+00> : vector<48x2xf32>
    %71 = tpu.matmul %5, %70, %cst_43 {dimension_numbers = #tpu.dot_dimension_numbers<[1], [0], [0], [1], [0, 0, 1, 1], [], []>} : vector<48x12xbf16>, vector<12x2xbf16>, vector<48x2xf32> -> vector<48x2xf32>
    %cst_44 = arith.constant 1.000000e-10 : f32
    %72 = vector.broadcast %cst_44 : f32 to vector<48x2xf32>
    %73 = arith.addf %71, %72 : vector<48x2xf32>
    %74 = tpu.reciprocal %73 {approx = true} : vector<48x2xf32> -> vector<48x2xf32>
    %75 = arith.mulf %67, %74 : vector<48x2xf32>
    %c0_45 = arith.constant 0 : index
    %c0_46 = arith.constant 0 : index
    %76 = vector.load %arg10[%c0_45, %c0_46] : memref<2x32xf32, #tpu.memory_space<vmem>>, vector<2x32xf32>
    %cst_47 = arith.constant dense<0.000000e+00> : vector<48x32xf32>
    %77 = tpu.matmul %75, %76, %cst_47 {dimension_numbers = #tpu.dot_dimension_numbers<[1], [0], [0], [1], [0, 0, 1, 1], [], []>} : vector<48x2xf32>, vector<2x32xf32>, vector<48x32xf32> -> vector<48x32xf32>
    %78 = arith.mulf %77, %38 : vector<48x32xf32>
    %79 = arith.truncf %78 : vector<48x32xf32> to vector<48x32xbf16>
    %cst_48 = arith.constant dense<0.000000e+00> : vector<12x32xf32>
    %80 = tpu.matmul %5, %79, %cst_48 {dimension_numbers = #tpu.dot_dimension_numbers<[0], [0], [1], [1], [0, 1, 1, 1], [], []>} : vector<48x12xbf16>, vector<48x32xbf16>, vector<12x32xf32> -> vector<12x32xf32>
    %c0_49 = arith.constant 0 : index
    %c0_50 = arith.constant 0 : index
    %81 = vector.load %arg11[%c0_49, %c0_50] : memref<32x16xf32, #tpu.memory_space<vmem>>, vector<32x16xf32>
    %cst_51 = arith.constant dense<0.000000e+00> : vector<12x16xf32>
    %82 = tpu.matmul %80, %81, %cst_51 {dimension_numbers = #tpu.dot_dimension_numbers<[1], [0], [0], [1], [0, 0, 1, 1], [], []>} : vector<12x32xf32>, vector<32x16xf32>, vector<12x16xf32> -> vector<12x16xf32>
    %83 = arith.addf %82, %3 : vector<12x16xf32>
    %cst_52 = arith.constant dense<0.000000e+00> : vector<16xf32>
    %84 = vector.multi_reduction <add>, %83, %cst_52 [0] : vector<12x16xf32> to vector<16xf32>
    %85 = vector.shape_cast %84 : vector<16xf32> to vector<1x16xf32>
    %cst_53 = arith.constant 1.200000e+01 : f32
    %86 = vector.broadcast %cst_53 : f32 to vector<1x16xf32>
    %87 = arith.divf %85, %86 : vector<1x16xf32>
    %88 = vector.broadcast %87 : vector<1x16xf32> to vector<12x16xf32>
    %89 = arith.subf %83, %88 : vector<12x16xf32>
    %90 = arith.mulf %89, %89 : vector<12x16xf32>
    %cst_54 = arith.constant dense<0.000000e+00> : vector<16xf32>
    %91 = vector.multi_reduction <add>, %90, %cst_54 [0] : vector<12x16xf32> to vector<16xf32>
    %92 = vector.shape_cast %91 : vector<16xf32> to vector<1x16xf32>
    %cst_55 = arith.constant 1.200000e+01 : f32
    %93 = vector.broadcast %cst_55 : f32 to vector<1x16xf32>
    %94 = arith.divf %92, %93 : vector<1x16xf32>
    %95 = vector.broadcast %87 : vector<1x16xf32> to vector<12x16xf32>
    %96 = arith.subf %83, %95 : vector<12x16xf32>
    %cst_56 = arith.constant 9.99999974E-6 : f32
    %97 = vector.broadcast %cst_56 : f32 to vector<1x16xf32>
    %98 = arith.addf %94, %97 : vector<1x16xf32>
    %99 = math.rsqrt %98 : vector<1x16xf32>
    %100 = vector.broadcast %99 : vector<1x16xf32> to vector<12x16xf32>
    %101 = arith.mulf %96, %100 : vector<12x16xf32>
    %c0_57 = arith.constant 0 : index
    %c0_58 = arith.constant 0 : index
    %c0_59 = arith.constant 0 : index
    %102 = vector.load %arg28[%c0_57, %c0_58, %c0_59] : memref<1x1x16xf32, #tpu.memory_space<vmem>>, vector<1x1x16xf32>
    %103 = vector.shape_cast %102 : vector<1x1x16xf32> to vector<1x16xf32>
    %104 = vector.broadcast %103 : vector<1x16xf32> to vector<12x16xf32>
    %105 = arith.mulf %101, %104 : vector<12x16xf32>
    %c0_60 = arith.constant 0 : index
    %c0_61 = arith.constant 0 : index
    %c0_62 = arith.constant 0 : index
    %106 = vector.load %arg29[%c0_60, %c0_61, %c0_62] : memref<1x1x16xf32, #tpu.memory_space<vmem>>, vector<1x1x16xf32>
    %107 = vector.shape_cast %106 : vector<1x1x16xf32> to vector<1x16xf32>
    %108 = vector.broadcast %107 : vector<1x16xf32> to vector<12x16xf32>
    %109 = arith.addf %105, %108 : vector<12x16xf32>
    %c0_63 = arith.constant 0 : index
    %c0_64 = arith.constant 0 : index
    %110 = vector.load %arg31[%c0_63, %c0_64] : memref<12x16xf32, #tpu.memory_space<vmem>>, vector<12x16xf32>
    tpu.vector_store %arg31[%c0_63, %c0_64], %109 {strides = array<i32>} : memref<12x16xf32, #tpu.memory_space<vmem>>, vector<12x16xf32>,
    %c1_i32 = arith.constant 1 : i32
    %111 = arith.cmpi eq, %arg0, %c1_i32 : i32
    %112 = arith.extui %111 : i1 to i32
    %c0_i32_65 = arith.constant 0 : i32
    %113 = arith.cmpi ne, %112, %c0_i32_65 : i32
    scf.if %113 {
      %c0_66 = arith.constant 0 : index
      %c0_67 = arith.constant 0 : index
      %114 = vector.load %arg12[%c0_66, %c0_67] : memref<16x128xf32, #tpu.memory_space<vmem>>, vector<16x128xf32>
      %cst_68 = arith.constant dense<0.000000e+00> : vector<12x128xf32>
      %115 = tpu.matmul %109, %114, %cst_68 {dimension_numbers = #tpu.dot_dimension_numbers<[1], [0], [0], [1], [0, 0, 1, 1], [], []>} : vector<12x16xf32>, vector<16x128xf32>, vector<12x128xf32> -> vector<12x128xf32>
      %c0_69 = arith.constant 0 : index
      %c0_70 = arith.constant 0 : index
      %116 = vector.load %arg13[%c0_69, %c0_70] : memref<1x128xf32, #tpu.memory_space<vmem>>, vector<1x128xf32>
      %117 = vector.broadcast %116 : vector<1x128xf32> to vector<12x128xf32>
      %118 = arith.addf %115, %117 : vector<12x128xf32>
      %cst_71 = arith.constant 0.000000e+00 : f32
      %119 = vector.broadcast %cst_71 : f32 to vector<12x128xf32>
      %120 = arith.cmpf ogt, %118, %119 : vector<12x128xf32>
      %cst_72 = arith.constant 0.00999999977 : f32
      %121 = vector.broadcast %cst_72 : f32 to vector<12x128xf32>
      %122 = arith.mulf %121, %118 : vector<12x128xf32>
      %123 = arith.select %120, %118, %122 : vector<12x128xi1>, vector<12x128xf32>
      %c0_73 = arith.constant 0 : index
      %c0_74 = arith.constant 0 : index
      %124 = vector.load %arg14[%c0_73, %c0_74] : memref<128x2xf32, #tpu.memory_space<vmem>>, vector<128x2xf32>
      %cst_75 = arith.constant dense<0.000000e+00> : vector<12x2xf32>
      %125 = tpu.matmul %123, %124, %cst_75 {dimension_numbers = #tpu.dot_dimension_numbers<[1], [0], [0], [1], [0, 0, 1, 1], [], []>} : vector<12x128xf32>, vector<128x2xf32>, vector<12x2xf32> -> vector<12x2xf32>
      %c0_76 = arith.constant 0 : index
      %c0_77 = arith.constant 0 : index
      %126 = vector.load %arg15[%c0_76, %c0_77] : memref<1x2xf32, #tpu.memory_space<vmem>>, vector<1x2xf32>
      %127 = vector.broadcast %126 : vector<1x2xf32> to vector<12x2xf32>
      %128 = arith.addf %125, %127 : vector<12x2xf32>
      %c0_78 = arith.constant 0 : index
      %c0_79 = arith.constant 0 : index
      %129 = vector.load %arg16[%c0_78, %c0_79] : memref<128x32xf32, #tpu.memory_space<vmem>>, vector<128x32xf32>
      %cst_80 = arith.constant dense<0.000000e+00> : vector<12x32xf32>
      %130 = tpu.matmul %123, %129, %cst_80 {dimension_numbers = #tpu.dot_dimension_numbers<[1], [0], [0], [1], [0, 0, 1, 1], [], []>} : vector<12x128xf32>, vector<128x32xf32>, vector<12x32xf32> -> vector<12x32xf32>
      %c0_81 = arith.constant 0 : index
      %c0_82 = arith.constant 0 : index
      %131 = vector.load %arg17[%c0_81, %c0_82] : memref<1x32xf32, #tpu.memory_space<vmem>>, vector<1x32xf32>
      %132 = vector.broadcast %131 : vector<1x32xf32> to vector<12x32xf32>
      %133 = arith.addf %130, %132 : vector<12x32xf32>
      %c0_83 = arith.constant 0 : index
      %c0_84 = arith.constant 0 : index
      %134 = vector.load %arg9[%c0_83, %c0_84] : memref<12x3xbf16, #tpu.memory_space<vmem>>, vector<12x3xbf16>
      %c0_85 = arith.constant 0 : index
      %c0_86 = arith.constant 0 : index
      %135 = vector.load %arg6[%c0_85, %c0_86] : memref<12x1xf32, #tpu.memory_space<vmem>>, vector<12x1xf32>
      %c0_87 = arith.constant 0 : index
      %c0_88 = arith.constant 0 : index
      %136 = vector.load %arg18[%c0_87, %c0_88] : memref<1x2xf32, #tpu.memory_space<vmem>>, vector<1x2xf32>
      %cst_89 = arith.constant 5.000000e-01 : bf16
      %137 = vector.broadcast %cst_89 : bf16 to vector<12x3xbf16>
      %138 = arith.cmpf ogt, %134, %137 : vector<12x3xbf16>
      %139 = vector.extract_strided_slice %128 {offsets = [0, 0], sizes = [12, 1], strides = [1, 1]} : vector<12x2xf32> to vector<12x1xf32>
      %cst_90 = arith.constant -1.000000e+30 : f32
      %140 = vector.shape_cast %139 : vector<12x1xf32> to vector<12x1xf32>
      %141 = vector.broadcast %140 : vector<12x1xf32> to vector<12x3xf32>
      %142 = vector.broadcast %cst_90 : f32 to vector<12x3xf32>
      %143 = arith.select %138, %141, %142 : vector<12x3xi1>, vector<12x3xf32>
      %cst_91 = arith.constant dense<0xFF800000> : vector<3xf32>
      %144 = vector.multi_reduction <maximumf>, %143, %cst_91 [0] : vector<12x3xf32> to vector<3xf32>
      %145 = vector.shape_cast %144 : vector<3xf32> to vector<1x3xf32>
      %146 = vector.extract_strided_slice %128 {offsets = [0, 1], sizes = [12, 1], strides = [1, 1]} : vector<12x2xf32> to vector<12x1xf32>
      %cst_92 = arith.constant -1.000000e+30 : f32
      %147 = vector.shape_cast %146 : vector<12x1xf32> to vector<12x1xf32>
      %148 = vector.broadcast %147 : vector<12x1xf32> to vector<12x3xf32>
      %149 = vector.broadcast %cst_92 : f32 to vector<12x3xf32>
      %150 = arith.select %138, %148, %149 : vector<12x3xi1>, vector<12x3xf32>
      %cst_93 = arith.constant dense<0xFF800000> : vector<3xf32>
      %151 = vector.multi_reduction <maximumf>, %150, %cst_93 [0] : vector<12x3xf32> to vector<3xf32>
      %152 = vector.shape_cast %151 : vector<3xf32> to vector<1x3xf32>
      %153 = tpu.concatenate %145, %152 in 0 : vector<1x3xf32>, vector<1x3xf32> -> vector<2x3xf32>
      %154 = tpu.transpose %153, [1, 0] : vector<2x3xf32> -> vector<3x2xf32>
      %155 = arith.truncf %154 : vector<3x2xf32> to vector<3x2xbf16>
      %cst_94 = arith.constant dense<0.000000e+00> : vector<12x2xf32>
      %156 = tpu.matmul %134, %155, %cst_94 {dimension_numbers = #tpu.dot_dimension_numbers<[1], [0], [0], [1], [0, 0, 1, 1], [], []>} : vector<12x3xbf16>, vector<3x2xbf16>, vector<12x2xf32> -> vector<12x2xf32>
      %157 = vector.broadcast %136 : vector<1x2xf32> to vector<12x2xf32>
      %158 = vector.broadcast %135 : vector<12x1xf32> to vector<12x2xf32>
      %159 = arith.mulf %157, %158 : vector<12x2xf32>
      %160 = arith.addf %159, %128 : vector<12x2xf32>
      %161 = arith.subf %160, %156 : vector<12x2xf32>
      %162 = math.exp %161 : vector<12x2xf32>
      %163 = arith.truncf %162 : vector<12x2xf32> to vector<12x2xbf16>
      %cst_95 = arith.constant dense<0.000000e+00> : vector<3x2xf32>
      %164 = tpu.matmul %134, %163, %cst_95 {dimension_numbers = #tpu.dot_dimension_numbers<[0], [0], [1], [1], [0, 1, 1, 1], [], []>} : vector<12x3xbf16>, vector<12x2xbf16>, vector<3x2xf32> -> vector<3x2xf32>
      %165 = arith.truncf %164 : vector<3x2xf32> to vector<3x2xbf16>
      %cst_96 = arith.constant dense<0.000000e+00> : vector<12x2xf32>
      %166 = tpu.matmul %134, %165, %cst_96 {dimension_numbers = #tpu.dot_dimension_numbers<[1], [0], [0], [1], [0, 0, 1, 1], [], []>} : vector<12x3xbf16>, vector<3x2xbf16>, vector<12x2xf32> -> vector<12x2xf32>
      %cst_97 = arith.constant 1.000000e-10 : f32
      %167 = vector.broadcast %cst_97 : f32 to vector<12x2xf32>
      %168 = arith.addf %166, %167 : vector<12x2xf32>
      %169 = tpu.reciprocal %168 {approx = true} : vector<12x2xf32> -> vector<12x2xf32>
      %170 = arith.mulf %162, %169 : vector<12x2xf32>
      %c0_98 = arith.constant 0 : index
      %c0_99 = arith.constant 0 : index
      %171 = vector.load %arg19[%c0_98, %c0_99] : memref<2x32xf32, #tpu.memory_space<vmem>>, vector<2x32xf32>
      %cst_100 = arith.constant dense<0.000000e+00> : vector<12x32xf32>
      %172 = tpu.matmul %170, %171, %cst_100 {dimension_numbers = #tpu.dot_dimension_numbers<[1], [0], [0], [1], [0, 0, 1, 1], [], []>} : vector<12x2xf32>, vector<2x32xf32>, vector<12x32xf32> -> vector<12x32xf32>
      %c0_101 = arith.constant 0 : index
      %c0_102 = arith.constant 0 : index
      %173 = vector.load %arg9[%c0_101, %c0_102] : memref<12x3xbf16, #tpu.memory_space<vmem>>, vector<12x3xbf16>
      %174 = arith.mulf %172, %133 : vector<12x32xf32>
      %175 = arith.truncf %174 : vector<12x32xf32> to vector<12x32xbf16>
      %cst_103 = arith.constant dense<0.000000e+00> : vector<3x32xf32>
      %176 = tpu.matmul %173, %175, %cst_103 {dimension_numbers = #tpu.dot_dimension_numbers<[0], [0], [1], [1], [0, 1, 1, 1], [], []>} : vector<12x3xbf16>, vector<12x32xbf16>, vector<3x32xf32> -> vector<3x32xf32>
      %c0_104 = arith.constant 0 : index
      %c0_105 = arith.constant 0 : index
      %177 = vector.load %arg20[%c0_104, %c0_105] : memref<32x16xf32, #tpu.memory_space<vmem>>, vector<32x16xf32>
      %cst_106 = arith.constant dense<0.000000e+00> : vector<3x16xf32>
      %178 = tpu.matmul %176, %177, %cst_106 {dimension_numbers = #tpu.dot_dimension_numbers<[1], [0], [0], [1], [0, 0, 1, 1], [], []>} : vector<3x32xf32>, vector<32x16xf32>, vector<3x16xf32> -> vector<3x16xf32>
      %c0_107 = arith.constant 0 : index
      %c0_108 = arith.constant 0 : index
      %179 = vector.load %arg30[%c0_107, %c0_108] : memref<3x16xf32, #tpu.memory_space<vmem>>, vector<3x16xf32>
      tpu.vector_store %arg30[%c0_107, %c0_108], %178 {strides = array<i32>} : memref<3x16xf32, #tpu.memory_space<vmem>>, vector<3x16xf32>,
    } else {
    }
    return
  }
  func.func @transform_0(%arg0: i32) -> (i32, i32) {
    %c0_i32 = arith.constant 0 : i32
    %c0_i32_0 = arith.constant 0 : i32
    %c0_i32_1 = arith.constant 0 : i32
    return %c0_i32, %c0_i32_0 : i32, i32
  }
  func.func @transform_1(%arg0: i32) -> (i32, i32) {
    %c0_i32 = arith.constant 0 : i32
    %c0_i32_0 = arith.constant 0 : i32
    %c0_i32_1 = arith.constant 0 : i32
    return %c0_i32, %c0_i32_0 : i32, i32
  }
  func.func @transform_2(%arg0: i32) -> (i32, i32) {
    %c0_i32 = arith.constant 0 : i32
    %c0_i32_0 = arith.constant 0 : i32
    %c0_i32_1 = arith.constant 0 : i32
    return %c0_i32, %c0_i32_0 : i32, i32
  }
  func.func @transform_3(%arg0: i32) -> (i32, i32) {
    %c0_i32 = arith.constant 0 : i32
    %c0_i32_0 = arith.constant 0 : i32
    %c0_i32_1 = arith.constant 0 : i32
    return %c0_i32, %c0_i32_0 : i32, i32
  }
  func.func @transform_4(%arg0: i32) -> (i32, i32) {
    %c0_i32 = arith.constant 0 : i32
    %c0_i32_0 = arith.constant 0 : i32
    %c0_i32_1 = arith.constant 0 : i32
    return %c0_i32, %c0_i32_0 : i32, i32
  }
  func.func @transform_5(%arg0: i32) -> (i32, i32) {
    %c0_i32 = arith.constant 0 : i32
    %c0_i32_0 = arith.constant 0 : i32
    %c0_i32_1 = arith.constant 0 : i32
    return %c0_i32, %c0_i32_0 : i32, i32
  }
  func.func @transform_6(%arg0: i32) -> (i32, i32) {
    %c0_i32 = arith.constant 0 : i32
    %c0_i32_0 = arith.constant 0 : i32
    %c0_i32_1 = arith.constant 0 : i32
    return %c0_i32, %c0_i32_0 : i32, i32
  }
  func.func @transform_7(%arg0: i32) -> (i32, i32) {
    %c0_i32 = arith.constant 0 : i32
    %c0_i32_0 = arith.constant 0 : i32
    %c0_i32_1 = arith.constant 0 : i32
    return %c0_i32, %c0_i32_0 : i32, i32
  }
  func.func @transform_8(%arg0: i32) -> (i32, i32) {
    %c0_i32 = arith.constant 0 : i32
    %c0_i32_0 = arith.constant 0 : i32
    %c0_i32_1 = arith.constant 0 : i32
    return %c0_i32, %c0_i32_0 : i32, i32
  }
  func.func @transform_9(%arg0: i32) -> (i32, i32) {
    %c0_i32 = arith.constant 0 : i32
    %c0_i32_0 = arith.constant 0 : i32
    %c0_i32_1 = arith.constant 0 : i32
    return %c0_i32, %c0_i32_0 : i32, i32
  }
  func.func @transform_10(%arg0: i32) -> (i32, i32) {
    %c0_i32 = arith.constant 0 : i32
    %c0_i32_0 = arith.constant 0 : i32
    %c0_i32_1 = arith.constant 0 : i32
    return %c0_i32, %c0_i32_0 : i32, i32
  }
  func.func @transform_11(%arg0: i32) -> (i32, i32) {
    %c0_i32 = arith.constant 0 : i32
    %c0_i32_0 = arith.constant 0 : i32
    %c0_i32_1 = arith.constant 0 : i32
    return %c0_i32, %c0_i32_0 : i32, i32
  }
  func.func @transform_12(%arg0: i32) -> (i32, i32) {
    %c0_i32 = arith.constant 0 : i32
    %c0_i32_0 = arith.constant 0 : i32
    %c0_i32_1 = arith.constant 0 : i32
    return %c0_i32, %c0_i32_0 : i32, i32
  }
  func.func @transform_13(%arg0: i32) -> (i32, i32) {
    %c0_i32 = arith.constant 0 : i32
    %c0_i32_0 = arith.constant 0 : i32
    %c0_i32_1 = arith.constant 0 : i32
    return %c0_i32, %c0_i32_0 : i32, i32
  }
  func.func @transform_14(%arg0: i32) -> (i32, i32) {
    %c0_i32 = arith.constant 0 : i32
    %c0_i32_0 = arith.constant 0 : i32
    %c0_i32_1 = arith.constant 0 : i32
    return %c0_i32, %c0_i32_0 : i32, i32
  }
  func.func @transform_15(%arg0: i32) -> (i32, i32) {
    %c0_i32 = arith.constant 0 : i32
    %c0_i32_0 = arith.constant 0 : i32
    %c0_i32_1 = arith.constant 0 : i32
    return %c0_i32, %c0_i32_0 : i32, i32
  }
  func.func @transform_16(%arg0: i32) -> (i32, i32) {
    %c0_i32 = arith.constant 0 : i32
    %c0_i32_0 = arith.constant 0 : i32
    %c0_i32_1 = arith.constant 0 : i32
    return %c0_i32, %c0_i32_0 : i32, i32
  }
  func.func @transform_17(%arg0: i32) -> (i32, i32) {
    %c0_i32 = arith.constant 0 : i32
    %c0_i32_0 = arith.constant 0 : i32
    %c0_i32_1 = arith.constant 0 : i32
    return %c0_i32, %c0_i32_0 : i32, i32
  }
  func.func @transform_18(%arg0: i32) -> (i32, i32) {
    %c0_i32 = arith.constant 0 : i32
    %c0_i32_0 = arith.constant 0 : i32
    %c0_i32_1 = arith.constant 0 : i32
    return %c0_i32, %c0_i32_0 : i32, i32
  }
  func.func @transform_19(%arg0: i32) -> (i32, i32) {
    %c0_i32 = arith.constant 0 : i32
    %c0_i32_0 = arith.constant 0 : i32
    %c0_i32_1 = arith.constant 0 : i32
    return %c0_i32, %c0_i32_0 : i32, i32
  }
  func.func @transform_20(%arg0: i32) -> (i32, i32, i32) {
    %c0_i32 = arith.constant 0 : i32
    %c0_i32_0 = arith.constant 0 : i32
    %c0_i32_1 = arith.constant 0 : i32
    return %arg0, %c0_i32, %c0_i32_0 : i32, i32, i32
  }
  func.func @transform_21(%arg0: i32) -> (i32, i32, i32) {
    %c0_i32 = arith.constant 0 : i32
    %c0_i32_0 = arith.constant 0 : i32
    %c0_i32_1 = arith.constant 0 : i32
    return %arg0, %c0_i32, %c0_i32_0 : i32, i32, i32
  }
  func.func @transform_22(%arg0: i32) -> (i32, i32, i32) {
    %c0_i32 = arith.constant 0 : i32
    %c0_i32_0 = arith.constant 0 : i32
    %c0_i32_1 = arith.constant 0 : i32
    return %arg0, %c0_i32, %c0_i32_0 : i32, i32, i32
  }
  func.func @transform_23(%arg0: i32) -> (i32, i32, i32) {
    %c0_i32 = arith.constant 0 : i32
    %c0_i32_0 = arith.constant 0 : i32
    %c0_i32_1 = arith.constant 0 : i32
    return %arg0, %c0_i32, %c0_i32_0 : i32, i32, i32
  }
  func.func @transform_24(%arg0: i32) -> (i32, i32, i32) {
    %c0_i32 = arith.constant 0 : i32
    %c0_i32_0 = arith.constant 0 : i32
    %c0_i32_1 = arith.constant 0 : i32
    return %arg0, %c0_i32, %c0_i32_0 : i32, i32, i32
  }
  func.func @transform_25(%arg0: i32) -> (i32, i32, i32) {
    %c0_i32 = arith.constant 0 : i32
    %c0_i32_0 = arith.constant 0 : i32
    %c0_i32_1 = arith.constant 0 : i32
    return %arg0, %c0_i32, %c0_i32_0 : i32, i32, i32
  }
  func.func @transform_26(%arg0: i32) -> (i32, i32, i32) {
    %c0_i32 = arith.constant 0 : i32
    %c0_i32_0 = arith.constant 0 : i32
    %c0_i32_1 = arith.constant 0 : i32
    return %arg0, %c0_i32, %c0_i32_0 : i32, i32, i32
  }
  func.func @transform_27(%arg0: i32) -> (i32, i32, i32) {
    %c0_i32 = arith.constant 0 : i32
    %c0_i32_0 = arith.constant 0 : i32
    %c0_i32_1 = arith.constant 0 : i32
    return %arg0, %c0_i32, %c0_i32_0 : i32, i32, i32
  }
  func.func @transform_28(%arg0: i32) -> (i32, i32, i32) {
    %c0_i32 = arith.constant 0 : i32
    %c0_i32_0 = arith.constant 0 : i32
    %c0_i32_1 = arith.constant 0 : i32
    return %arg0, %c0_i32, %c0_i32_0 : i32, i32, i32
  }
  func.func @transform_29(%arg0: i32) -> (i32, i32) {
    %c0_i32 = arith.constant 0 : i32
    %c0_i32_0 = arith.constant 0 : i32
    %c0_i32_1 = arith.constant 0 : i32
    return %c0_i32, %c0_i32_0 : i32, i32
  }
}

</mosaic_0001>

<bundles_post_ra>
// kernel: tpu_custom_call.1
= control target key start
LH: loop header
LB: loop body
LE: loop exit
PB: predicated region body
PF: predicated region fallthrough
CT: control target
= control target key end

     0   :  { %s2821_s6 = smov 1   ;;  %s2822_s10 = smov 2   ;;  %s3373_s0 = inlined_call_operand.smem [shape: u32[30], index: -1, kind: input, shape index: {}] }
   0x1   :  { %s2867_s5 = sld [smem:[%s3373_s0]]   ;;  %s2823_s14 = smov 3  }
   0x2   :  { %s2872_s9 = sld [smem:[%s3373_s0 + %s2821_s6]]   ;;  %s2824_s18 = smov 4  }
   0x3   :  { %s2877_s13 = sld [smem:[%s3373_s0 + %s2822_s10]]   ;;  %s2825_s22 = smov 5  }
   0x4   :  { %s2882_s17 = sld [smem:[%s3373_s0 + %s2823_s14]]   ;;  %s2826_s26 = smov 6  }
   0x5   :  { %s2887_s21 = sld [smem:[%s3373_s0 + %s2824_s18]]   ;;  %s2827_s30 = smov 7  }
   0x6   :  { %s2892_s25 = sld [smem:[%s3373_s0 + %s2825_s22]]   ;;  %s2828_s4 = smov 8  }
   0x7   :  { %s2897_s29 = sld [smem:[%s3373_s0 + %s2826_s26]]   ;;  %s2829_s10 = smov 9  }
   0x8   :  { %s2902_s3 = sld [smem:[%s3373_s0 + %s2827_s30]]   ;;  %s2830_s15 = smov 10  }
   0x9   :  { %s2907_s8 = sld [smem:[%s3373_s0 + %s2828_s4]]   ;;  %s2831_s20 = smov 11  }
   0xa   :  { %s2912_s14 = sld [smem:[%s3373_s0 + %s2829_s10]]   ;;  %s2832_s26 = smov 12  }
   0xb   :  { %s2917_s19 = sld [smem:[%s3373_s0 + %s2830_s15]]   ;;  %s2833_s1 = smov 13  }
   0xc   :  { %3383 = sst [smem:[#allocation6_spill]] %s2892_s25  ;;  %s2834_s7 = smov 14  }
   0xd   :  { %s2922_s24 = sld [smem:[%s3373_s0 + %s2831_s20]]   ;;  %s2835_s15 = smov 15  }
   0xe   :  { %s2927_s30 = sld [smem:[%s3373_s0 + %s2832_s26]]   ;;  %s2836_s22 = smov 16  }
   0xf   :  { %3384 = sst [smem:[#allocation7_spill]] %s2907_s8  ;;  %s2837_s28 = smov 17  }
  0x10   :  { %s2932_s6 = sld [smem:[%s3373_s0 + %s2833_s1]]  }
  0x11   :  { %3385 = sst [smem:[#allocation8_spill]] %s2917_s19 }
  0x12   :  { %s2937_s12 = sld [smem:[%s3373_s0 + %s2834_s7]]   ;;  %s2838_s7 = smov 18  }
  0x13   :  { %3386 = sst [smem:[#allocation9_spill]] %s2922_s24 }
  0x14   :  { %3387 = sst [smem:[#allocation10_spill]] %s2927_s30 }
  0x15   :  { %s2942_s20 = sld [smem:[%s3373_s0 + %s2835_s15]]   ;;  %s2839_s15 = smov 19  }
  0x16   :  { %3388 = sst [smem:[#allocation11_spill]] %s2932_s6 }
  0x17   :  { %s2947_s27 = sld [smem:[%s3373_s0 + %s2836_s22]]   ;;  %s2840_s22 = smov 20  }
  0x18   :  { %3389 = sst [smem:[#allocation12_spill]] %s2937_s12 }
  0x19   :  { %s2952_s4 = sld [smem:[%s3373_s0 + %s2837_s28]]   ;;  %s2841_s28 = smov 21  }
  0x1a   :  { %s2957_s8 = sld [smem:[%s3373_s0 + %s2838_s7]]   ;;  %s2842_s7 = smov 22  }
  0x1b   :  { %3390 = sst [smem:[#allocation13_spill]] %s2942_s20 }
  0x1c   :  { %s2962_s12 = sld [smem:[%s3373_s0 + %s2839_s15]]   ;;  %s2843_s15 = smov 23  }
  0x1d   :  { %3391 = sst [smem:[#allocation14_spill]] %s2947_s27 }
  0x1e   :  { %s2967_s27 = sld [smem:[%s3373_s0 + %s2840_s22]]   ;;  %s2844_s22 = smov 24  }
  0x1f   :  { %3392 = sst [smem:[#allocation15_spill]] %s2952_s4 }
  0x20   :  { %3393 = sst [smem:[#allocation16_spill]] %s2957_s8 }
  0x21   :  { %s2972_s4 = sld [smem:[%s3373_s0 + %s2841_s28]]   ;;  %s2845_s28 = smov 25  }
  0x22   :  { %3394 = sst [smem:[#allocation17_spill]] %s2962_s12 }
  0x23   :  { %s2977_s8 = sld [smem:[%s3373_s0 + %s2842_s7]]   ;;  %s2846_s7 = smov 26  }
  0x24   :  { %s2982_s12 = sld [smem:[%s3373_s0 + %s2843_s15]]   ;;  %s2847_s15 = smov 27  }
  0x25   :  { %s2987_s30 = sld [smem:[%s3373_s0 + %s2844_s22]]   ;;  %s2848_s22 = smov 28  }
  0x26   :  { %s2992_s25 = sld [smem:[%s3373_s0 + %s2845_s28]]   ;;  %s2849_s28 = smov 29  }
  0x27   :  { %s2997_s20 = sld [smem:[%s3373_s0 + %s2846_s7]]  }
  0x28   :  { %s3002_s6 = sld [smem:[%s3373_s0 + %s2847_s15]]  }
  0x29   :  { %s3007_s24 = sld [smem:[%s3373_s0 + %s2848_s22]]  }
  0x2a   :  { %s3012_s19 = sld [smem:[%s3373_s0 + %s2849_s28]]  }
  0x2b   :  { %64 = vsyncpa [#allocation4], 0  ;;  %s3014_s7 = smov 0  }
  0x2c LB: > { %3395 = sst [smem:[#allocation18_spill]] %s2819_s7  ;;  %s3020_s10 = sadd.s32 4294967295, %s2819_s7   ;;  %s2819_s7 = sphi %s3014_s7, %s70_s7  }
  0x2d   : > { %p2510_p0 = scmp.ge.s32.totalorder %s2819_s7, 1  ;;  %p881_p1 = scmp.lt.s32.totalorder %s2819_s7, 3 }
  0x2f   : > { %p882_p2 = pnand %p2510_p0, %p881_p1 }
  0x30   : > { %p980_p3 = scmp.lt.s32.totalorder (!%p882_p2), %s3020_s10, 1  ;;  %p2517_p4 = scmp.ne.s32.totalorder (!%p882_p2), %s3020_s10, 0 }
  0x31   : > { %885 = sbr.rel (%p882_p2) target bundleno = 3428 (0xd64), region = 136 }
  0x36   : > { %s3026_s0 = scalar_select %p980_p3, %s3020_s10, 1 }
  0x38   : > { %s2599_s11 = sshll.u32 %s3026_s0, 5  ;;  %s987_s15 = scalar_lea.vmem %s2972_s4, %s3026_s0 }
  0x39   : > { %s3032_s16 = scalar_lea.vmem %s2967_s27, %s2599_s11  ;;  %s2600_s18 = sshll.u32 %s3026_s0, 7 }
  0x3a   : > { %s3036_s22 = scalar_lea.vmem %s2977_s8, %s2600_s18  ;;  %s995_s23 = scalar_lea.vmem %s2982_s12, %s3026_s0 }
  0x3b   : > { %s3041_s26 = scalar_lea.vmem %s2987_s30, %s2600_s18  ;;  %s1003_s28 = scalar_lea.vmem %s2992_s25, %s3026_s0 }
  0x3c   : > { %s1006_s1 = scalar_lea.vmem %s2997_s20, %s3026_s0  ;;  %s1009_s2 = scalar_lea.vmem %s3002_s6, %s3026_s0 }
  0x3d   : > { %s1012_s7 = scalar_lea.vmem %s3007_s24, %s3026_s0  ;;  %1017 = sbr.rel (%p2517_p4) target bundleno = 202 (0xca), region = 140 }
  0x42   : > { %v1021_v0 = vld [vmem:[%s2872_s9 + $0x8] sm:$0xff]  ;;  %v1058_v1 = vld [vmem:[%s2882_s17] sm:$0xff]  ;;  %v2850_v3 = vmov 0   ;;  %vm1026_vm0 = vcmask 130048   ;;  %vm1080_vm1 = vcmask 124928   ;;  %v2851_v6 = vmov 0.0  }
  0x43   : > { %v1020_v2 = vld [vmem:[%s2872_s9] sm:$0xff]  ;;  %2682 = vset.pattern.permute.xlu0 %v2850_v3  ;;  %1047 = vmatpush.msra.mxu0 %v1021_v0  ;;  %v1019_v5 = vld [vmem:[%s2867_s5 + $0x8] sm:$0xf]  ;;  %1081 = vst.msk [vmem:[#allocation3] sm:$0x7] %vm1080_vm1, %v2851_v6  ;;  %v1056_v8 = vlaneseq  ;;  %vm1078_vm3 = vcmask 125952  }
  0x44   : > { %v1018_v4 = vld [vmem:[%s2867_s5] sm:$0xff]  ;;  %2609 = vmatpush.msra.mxu1 %v1021_v0  ;;  %1065 = vperm.xlu0 %2682, %v1058_v1   ;;  %v1059_v7 = vld [vmem:[%s2882_s17 + $0x8] sm:$0xf] }
  0x45   : > { %1048 = vmatpush.msra.mxu0 %v1020_v2  ;;  %v1057_v10 = vand.u32 127, %v1056_v8  ;;  %v2683_v11 = vld [vmem:[%s2877_s13] ss:$0 sm:$0xff] }
  0x46   : > { %2610 = vmatpush.msra.mxu1 %v1020_v2  ;;  %2518 = vmatmul.msk.f32.vlgmr.msra.gmra.mxu0 %vm1026_vm0, %v1018_v4 }
  0x47   : > { %2519 = vmatmul.msk.f32.vlgmr.msra.gmra.mxu1 %vm1026_vm0, %v1019_v5  ;;  %vm1060_vm2 = vcmp.eq.s32.totalorder %v1057_v10, 15 }
  0x48   : > { %v2520_v12 = vsel %vm1060_vm2, 1.0, %v2851_v6 }
  0x4c   : > { %1070 = vperm.xlu0 %2682, %v1059_v7  }
  0xb6   : > { %v1066_v9 = vpop.permute.xlu0 %1065 }
  0xb7   : > { %v1073_v15 = vmul.f32 %v2520_v12, %v1066_v9 }
  0xbe   : > { %v1071_v13 = vpop.permute.xlu0 %1070 }
  0xbf   : > { %v1074_v18 = vmul.f32 %v2520_v12, %v1071_v13 }
  0xc3   : > { %v1050_v14 = vpop.f32.mrf.mxu0 }
  0xc4   : > { %v1051_v16 = vadd.f32 %v2683_v11, %v1050_v14  ;;  %v1053_v17 = vpop.f32.mrf.mxu1 }
  0xc5   : > { %v1054_v19 = vadd.f32 %v2683_v11, %v1053_v17 }
  0xc6   : > { %v1075_v20 = vadd.f32 %v1073_v15, %v1051_v16 }
  0xc7   : > { %v1076_v21 = vadd.f32 %v1074_v18, %v1054_v19 }
  0xc8   : > { %1077 = vst.msk [vmem:[#allocation2] sm:$0xff] %vm1026_vm0, %v1075_v20 }
  0xc9   : > { %1079 = vst.msk [vmem:[#allocation2 + $0x8] sm:$0xf] %vm1078_vm3, %v1076_v21 }
  0xca PF: > { %vm1122_vm4 = vcmask 1045504   ;;  %v3069_v25 = vld [vmem:[%s2897_s29] sm:$0xff]  ;;  %v3073_v27 = vld [vmem:[%s2897_s29 + $0x10] sm:$0xff]  ;;  %vm1112_vm5 = vcmask 97280   ;;  %v3080_v28 = vld [vmem:[%s2897_s29 + $0x8] sm:$0xff]  ;;  %vm1202_vm6 = vcmask 130048  }
  0xcb   : > { %v2605_v29 = vld [vmem:[%s2902_s3] sm:$0xff]  ;;  %v1199_v30 = vld [vmem:[%s3032_s16 + $0x8] sm:$0xff]  ;;  %v2607_v32 = vld [vmem:[%s2902_s3 + $0x10] sm:$0xff]  ;;  %vm1566_vm3 = vcmask 1040384   ;;  %s3402_s11 = sld [smem:[#allocation8_spill]]  ;;  %p2580_p5 = scmp.ne.s32.totalorder %s3020_s10, 1 }
  0xcc   : > { %1288 = vmatpush.msra.mxu3 %v1199_v30  ;;  %v2606_v31 = vld [vmem:[%s2902_s3 + $0x8] sm:$0xff]  ;;  %v1198_v33 = vld [vmem:[%s3032_s16] sm:$0xff]  ;;  %v1201_v34 = vld [vmem:[%s3032_s16 + $0x18] sm:$0xff]  ;;  %s3405_s18 = sld [smem:[#allocation13_spill]] (!%p2580_p5) }
  0xcd   : > { %1235 = vmatpush.msra.mxu2 %v1201_v34  ;;  %v1200_v35 = vld [vmem:[%s3032_s16 + $0x10] sm:$0xff]  ;;  %v1352_v44 = vld [vmem:[%s3036_s22 + $0x78] sm:$0xff]  ;;  %v1350_v48 = vld [vmem:[%s3036_s22 + $0x68] sm:$0xff]  ;;  %s3404_s16 = sld [smem:[#allocation11_spill]] (!%p2580_p5) }
  0xce   : > { %1289 = vmatpush.msra.mxu3 %v1198_v33  ;;  %v1407_v45 = vld [vmem:[%s3041_s26 + $0x78] sm:$0xff]  ;;  %v1351_v46 = vld [vmem:[%s3036_s22 + $0x70] sm:$0xff]  ;;  %v1405_v49 = vld [vmem:[%s3041_s26 + $0x68] sm:$0xff] }
  0xcf   : > { %v3062_v22 = vld [vmem:[#allocation2] sm:$0xff]  ;;  %1236 = vmatpush.msra.mxu2 %v1200_v35  ;;  %v1406_v47 = vld [vmem:[%s3041_s26 + $0x70] sm:$0xff]  ;;  %v1348_v56 = vld [vmem:[%s3036_s22 + $0x58] sm:$0xff] }
  0xd0   : > { %v3064_v23 = vld [vmem:[#allocation2 + $0x8] sm:$0xf]  ;;  %v1349_v50 = vld [vmem:[%s3036_s22 + $0x60] sm:$0xff]  ;;  %v1403_v57 = vld [vmem:[%s3041_s26 + $0x58] sm:$0xff] }
  0xd1   : > { %v1084_v24 = vpack.c.bf16 %v3064_v23, %v3062_v22  ;;  %2612 = vmatpush.msrb.mxu2 %v1352_v44  ;;  %v1404_v51 = vld [vmem:[%s3041_s26 + $0x60] sm:$0xff]  ;;  %v1347_v58 = vld [vmem:[%s3036_s22 + $0x50] sm:$0xff]  ;;  %v1346_v60 = vld [vmem:[%s3036_s22 + $0x48] sm:$0xff] }
  0xd2   : > { %v1402_v59 = vld [vmem:[%s3041_s26 + $0x50] sm:$0xff]  ;;  %v1401_v61 = vld [vmem:[%s3041_s26 + $0x48] sm:$0xff]  ;;  %v1345_v62 = vld [vmem:[%s3036_s22 + $0x40] sm:$0xff] }
  0xd3   : > { %v1124_v26 = vsel %vm1122_vm4, %v1084_v24, 0  ;;  %2613 = vmatpush.msrb.mxu2 %v1351_v46  ;;  %v1400_v63 = vld [vmem:[%s3041_s26 + $0x40] sm:$0xff]  ;;  %v1344_v0 = vld [vmem:[%s3036_s22 + $0x38] sm:$0xff]  ;;  %v1343_v2 = vld [vmem:[%s3036_s22 + $0x30] sm:$0xff] }
  0xd4   : > { %1133 = vmatpush.bf16.msra.mxu0 %v1124_v26  ;;  %2611 = vmatpush.bf16.msra.mxu1 %v1124_v26  ;;  %v1399_v1 = vld [vmem:[%s3041_s26 + $0x38] sm:$0xff]  ;;  %v1398_v3 = vld [vmem:[%s3041_s26 + $0x30] sm:$0xff]  ;;  %v1342_v4 = vld [vmem:[%s3036_s22 + $0x28] sm:$0xff] }
  0xd5   : > { %2614 = vmatpush.msrb.mxu2 %v1350_v48  ;;  %v1397_v5 = vld [vmem:[%s3041_s26 + $0x28] sm:$0xff]  ;;  %v1341_v6 = vld [vmem:[%s3036_s22 + $0x20] sm:$0xff]  ;;  %v1340_v8 = vld [vmem:[%s3036_s22 + $0x18] sm:$0xff] }
  0xd6   : > { %v1396_v7 = vld [vmem:[%s3041_s26 + $0x20] sm:$0xff]  ;;  %v1395_v9 = vld [vmem:[%s3041_s26 + $0x18] sm:$0xff]  ;;  %v1339_v10 = vld [vmem:[%s3036_s22 + $0x10] sm:$0xff] }
  0xd7   : > { %2533 = vmatmul.msk.bf16.vlgmr.msra.gmra.mxu0 %vm1112_vm5, %v3069_v25  ;;  %2535 = vmatmul.msk.bf16.vlgmr.msra.gmra.mxu1 %vm1112_vm5, %v3073_v27  ;;  %v1394_v11 = vld [vmem:[%s3041_s26 + $0x10] sm:$0xff]  ;;  %v1338_v12 = vld [vmem:[%s3036_s22 + $0x8] sm:$0xff]  ;;  %v1337_v14 = vld [vmem:[%s3036_s22] sm:$0xff]  ;;  %s3408_s22 = sld [smem:[#allocation10_spill]] (!%p2580_p5) }
  0xd8   : > { %1181 = vmatpush.bf16.msrb.mxu1 %v1124_v26  ;;  %1357 = vmatpush.msrb.mxu0 %v1352_v44  ;;  %v1393_v13 = vld [vmem:[%s3041_s26 + $0x8] sm:$0xff]  ;;  %v1392_v15 = vld [vmem:[%s3041_s26] sm:$0xff]  ;;  %s3410_s26 = sld [smem:[#allocation7_spill]] (!%p2580_p5) }
  0xd9   : > { %2615 = vmatpush.msrb.mxu2 %v1349_v50  ;;  %v2720_v17 = vld [vmem:[%s987_s15] ss:$0 sm:$0xff]  ;;  %s3403_s15 = sld [smem:[#allocation9_spill]] (!%p2580_p5) }
  0xda   : > { %1358 = vmatpush.msrb.mxu0 %v1351_v46 }
  0xdb   : > { %2616 = vmatpush.msrb.mxu2 %v1348_v56 }
  0xdc   : > { %1412 = vmatpush.msra.mxu1 %v1407_v45  ;;  %1359 = vmatpush.msrb.mxu0 %v1350_v48 }
  0xdd   : > { %2617 = vmatpush.msrb.mxu2 %v1347_v58 }
  0xde   : > { %1413 = vmatpush.msra.mxu1 %v1406_v47  ;;  %1360 = vmatpush.msrb.mxu0 %v1349_v50 }
  0xdf   : > { %2618 = vmatpush.msrb.mxu2 %v1346_v60 }
  0xe0   : > { %1414 = vmatpush.msra.mxu1 %v1405_v49  ;;  %1361 = vmatpush.msrb.mxu0 %v1348_v56 }
  0xe1   : > { %2619 = vmatpush.msrb.mxu2 %v1345_v62 }
  0xe2   : > { %1415 = vmatpush.msra.mxu1 %v1404_v51  ;;  %1362 = vmatpush.msrb.mxu0 %v1347_v58  ;;  %v2852_v58 = vmov 1  }
  0xe3   : > { %2620 = vmatpush.msrb.mxu2 %v1344_v0  ;;  %2695 = vset.pattern.permute.xlu1 %v2852_v58 }
  0xe4   : > { %1416 = vmatpush.msra.mxu1 %v1403_v57  ;;  %1363 = vmatpush.msrb.mxu0 %v1346_v60 }
  0xe5   : > { %2621 = vmatpush.msrb.mxu2 %v1343_v2 }
  0xe6   : > { %1417 = vmatpush.msra.mxu1 %v1402_v59  ;;  %1364 = vmatpush.msrb.mxu0 %v1345_v62  ;;  %v2853_v59 = vmov 0  }
  0xe7   : > { %2534 = vmatmul.msk.bf16.gmra.mxu0 %vm1112_vm5, %v3080_v28  ;;  %2548 = vmatmul.msk.bf16.vlgmr.msrb.gmra.mxu1 %vm1112_vm5, %v2605_v29 }
  0xe8   : > { %1418 = vmatpush.msra.mxu1 %v1401_v61  ;;  %1365 = vmatpush.msrb.mxu0 %v1344_v0  ;;  %v2721_v61 = vld [vmem:[%s995_s23] ss:$0 sm:$0xff]  ;;  %s3409_s23 = sld [smem:[#allocation12_spill]] (!%p2580_p5) }
  0xe9   : > { %2622 = vmatpush.msrb.mxu2 %v1342_v4  ;;  %2684 = vset.pattern.permute.xlu0 %v2853_v59 }
  0xea   : > { %1419 = vmatpush.msra.mxu1 %v1400_v63  ;;  %1366 = vmatpush.msrb.mxu0 %v1343_v2 }
  0xeb   : > { %2623 = vmatpush.msrb.mxu2 %v1341_v6  ;;  %2706 = vset.pattern.permute.xlu2 %v2853_v59 }
  0xec   : > { %1420 = vmatpush.msra.mxu1 %v1399_v1  ;;  %1367 = vmatpush.msrb.mxu0 %v1342_v4 }
  0xed   : > { %2624 = vmatpush.msrb.mxu2 %v1340_v8 }
  0xee   : > { %1421 = vmatpush.msra.mxu1 %v1398_v3  ;;  %1368 = vmatpush.msrb.mxu0 %v1341_v6 }
  0xef   : > { %2625 = vmatpush.msrb.mxu2 %v1339_v10 }
  0xf0   : > { %1422 = vmatpush.msra.mxu1 %v1397_v5  ;;  %1369 = vmatpush.msrb.mxu0 %v1340_v8  ;;  %v1452_v8 = vld [vmem:[%s2887_s21 + $0x28] sm:$0xff] }
  0xf1   : > { %2626 = vmatpush.msrb.mxu2 %v1338_v12 }
  0xf2   : > { %1423 = vmatpush.msra.mxu1 %v1396_v7  ;;  %1370 = vmatpush.msrb.mxu0 %v1339_v10 }
  0xf3   : > { %2627 = vmatpush.msrb.mxu2 %v1337_v14 }
  0xf4   : > { %1424 = vmatpush.msra.mxu1 %v1395_v9  ;;  %1371 = vmatpush.msrb.mxu0 %v1338_v12 }
  0xf6   : > { %1425 = vmatpush.msra.mxu1 %v1394_v11  ;;  %1372 = vmatpush.msrb.mxu0 %v1337_v14  ;;  %v1451_v14 = vld [vmem:[%s2887_s21 + $0x20] sm:$0xff] }
  0xf7   : > { %2549 = vmatmul.msk.bf16.gmra.mxu1 %vm1112_vm5, %v2606_v31 }
  0xf8   : > { %1426 = vmatpush.msra.mxu1 %v1393_v13  ;;  %v1450_v13 = vld [vmem:[%s2887_s21 + $0x18] sm:$0xff] }
  0xfa   : > { %1427 = vmatpush.msra.mxu1 %v1392_v15  ;;  %v1448_v15 = vld [vmem:[%s2887_s21 + $0x8] sm:$0xff] }
 0x107   : > { %2550 = vmatmul.msk.bf16.gmra.mxu1 %vm1112_vm5, %v2607_v32 }
 0x154   : > { %v1135_v36 = vpop.f32.mrf.mxu0  ;;  %v1145_v37 = vpop.f32.mrf.mxu1 }
 0x155   : > { %2557 = vmatmul.msk.f32.vlgmr.msra.gmra.mxu3 %vm1202_vm6, %v1135_v36 }
 0x15c   : > { %v1137_v38 = vpop.f32.mrf.mxu0  ;;  %v1147_v39 = vpop.f32.mrf.mxu1 }
 0x15d   : > { %2558 = vmatmul.msk.f32.gmra.mxu3 %vm1202_vm6, %v1137_v38 }
 0x164   : > { %v1140_v40 = vpop.f32.mrf.mxu0  ;;  %v1183_v41 = vpop.f32.mrf.mxu1 }
 0x165   : > { %2551 = vmatmul.msk.f32.vlgmr.msra.gmra.mxu2 %vm1202_vm6, %v1183_v41  ;;  %2559 = vmatmul.msk.f32.gmra.mxu3 %vm1202_vm6, %v1140_v40 }
 0x16c   : > { %v1142_v42 = vpop.f32.mrf.mxu0  ;;  %v1185_v43 = vpop.f32.mrf.mxu1 }
 0x16d   : > { %2552 = vmatmul.msk.f32.gmra.mxu2 %vm1202_vm6, %v1185_v43  ;;  %2560 = vmatmul.msk.f32.gmra.mxu3 %vm1202_vm6, %v1142_v42 }
 0x174   : > { %v1188_v52 = vpop.f32.mrf.mxu1 }
 0x175   : > { %2553 = vmatmul.msk.f32.gmra.mxu2 %vm1202_vm6, %v1188_v52  ;;  %2561 = vmatmul.msk.f32.gmra.mxu3 %vm1202_vm6, %v1145_v37 }
 0x17c   : > { %v1190_v53 = vpop.f32.mrf.mxu1 }
 0x17d   : > { %2554 = vmatmul.msk.f32.gmra.mxu2 %vm1202_vm6, %v1190_v53  ;;  %2562 = vmatmul.msk.f32.gmra.mxu3 %vm1202_vm6, %v1147_v39 }
 0x184   : > { %v1193_v54 = vpop.f32.mrf.mxu1 }
 0x185   : > { %2555 = vmatmul.msk.f32.gmra.mxu2 %vm1202_vm6, %v1193_v54 }
 0x18c   : > { %v1195_v55 = vpop.f32.mrf.mxu1 }
 0x18d   : > { %2556 = vmatmul.msk.f32.gmra.mxu2 %vm1202_vm6, %v1195_v55 }
 0x1d8   : > { %v1291_v16 = vpop.f32.mrf.mxu3 }
 0x1e0   : > { %v1294_v18 = vpop.f32.mrf.mxu3 }
 0x1e8   : > { %v1238_v19 = vpop.f32.mrf.mxu2  ;;  %v1297_v31 = vpop.f32.mrf.mxu3 }
 0x1e9   : > { %v1292_v20 = vadd.f32 %v1291_v16, %v1238_v19  ;;  %v1449_v16 = vld [vmem:[%s2887_s21 + $0x10] sm:$0xff]  ;;  %v1087_v19 = vld [vmem:[%s2897_s29 + $0x8] sm:$0xff]  }
 0x1eb   : > { %v1313_v21 = vadd.f32 %v2720_v17, %v1292_v20  ;;  %v1457_v20 = vunpack.c.h.bf16 %v1087_v19 }
 0x1ed   : > { %vm1319_vm7 = vcmp.gt.f32.partialorder %v1313_v21, 0.0  ;;  %v1325_v24 = vmul.f32 0.01, %v1313_v21  ;;  %vm3172_vm13 = vcmp.gt.f32.partialorder %v1457_v20, 0.5 }
 0x1ef   : > { %v1331_v26 = vsel %vm1319_vm7, %v1313_v21, %v1325_v24  ;;  %v1085_v21 = vld [vmem:[%s2897_s29] sm:$0xff]   ;;  %v1456_v24 = vunpack.c.l.bf16 %v1087_v19  ;;  %vm1713_vm7 = vcmask 392192  }
 0x1f0   : > { %v1241_v29 = vpop.f32.mrf.mxu2  ;;  %1373 = vmatmul.f32.vlgmr.msrb.gmra.mxu0 %v1331_v26  ;;  %1428 = vmatmul.f32.vlgmr.msra.gmra.mxu1 %v1331_v26  ;;  %v1300_v38 = vpop.f32.mrf.mxu3 }
 0x1f1   : > { %v1295_v30 = vadd.f32 %v1294_v18, %v1241_v29  ;;  %v1454_v29 = vunpack.c.l.bf16 %v1085_v21  ;;  %vm3176_vm14 = vcmp.gt.f32.partialorder %v1456_v24, 0.5 }
 0x1f3   : > { %v1314_v32 = vadd.f32 %v2720_v17, %v1295_v30  ;;  %v1455_v30 = vunpack.c.h.bf16 %v1085_v21  ;;  %vm1460_vm15 = vcmp.gt.f32.partialorder %v1454_v29, 0.5 }
 0x1f5   : > { %vm1320_vm8 = vcmp.gt.f32.partialorder %v1314_v32, 0.0  ;;  %v1326_v33 = vmul.f32 0.01, %v1314_v32  ;;  %vm1461_vm0 = vcmp.gt.f32.partialorder %v1455_v30, 0.5 }
 0x1f7   : > { %v1332_v34 = vsel %vm1320_vm8, %v1314_v32, %v1326_v33  ;;  %vm1791_vm8 = vcmask 1041408  }
 0x1f8   : > { %v1244_v35 = vpop.f32.mrf.mxu2  ;;  %1376 = vmatmul.f32.gmra.mxu0 %v1332_v34  ;;  %1431 = vmatmul.f32.gmra.mxu1 %v1332_v34  ;;  %v1303_v45 = vpop.f32.mrf.mxu3 }
 0x1f9   : > { %v1298_v36 = vadd.f32 %v1297_v31, %v1244_v35 }
 0x1fb   : > { %v1315_v37 = vadd.f32 %v2720_v17, %v1298_v36 }
 0x1fd   : > { %vm1321_vm9 = vcmp.gt.f32.partialorder %v1315_v37, 0.0  ;;  %v1327_v39 = vmul.f32 0.01, %v1315_v37 }
 0x1ff   : > { %v1333_v40 = vsel %vm1321_vm9, %v1315_v37, %v1327_v39  ;;  %v1089_v39 = vld [vmem:[%s2897_s29 + $0x10] sm:$0xff]   ;;  %vm1772_vm9 = vcmask 15360  }
 0x200   : > { %v1247_v41 = vpop.f32.mrf.mxu2  ;;  %1379 = vmatmul.f32.gmra.mxu0 %v1333_v40  ;;  %1434 = vmatmul.f32.gmra.mxu1 %v1333_v40  ;;  %v1306_v52 = vpop.f32.mrf.mxu3 }
 0x201   : > { %v1301_v42 = vadd.f32 %v1300_v38, %v1247_v41 }
 0x203   : > { %v1316_v43 = vadd.f32 %v2720_v17, %v1301_v42 }
 0x205   : > { %vm1322_vm10 = vcmp.gt.f32.partialorder %v1316_v43, 0.0  ;;  %v1328_v44 = vmul.f32 0.01, %v1316_v43 }
 0x207   : > { %v1334_v46 = vsel %vm1322_vm10, %v1316_v43, %v1328_v44  ;;  %vm1857_vm10 = vcmask 261120  }
 0x208   : > { %v1250_v47 = vpop.f32.mrf.mxu2  ;;  %1382 = vmatmul.f32.gmra.mxu0 %v1334_v46  ;;  %1437 = vmatmul.f32.gmra.mxu1 %v1334_v46  ;;  %v1458_v46 = vunpack.c.l.bf16 %v1089_v39 }
 0x209   : > { %v1304_v48 = vadd.f32 %v1303_v45, %v1250_v47  ;;  %v1459_v47 = vunpack.c.h.bf16 %v1089_v39 }
 0x20a   : > { %vm3194_vm1 = vcmp.gt.f32.partialorder %v1458_v46, 0.5 }
 0x20b   : > { %v1317_v49 = vadd.f32 %v2720_v17, %v1304_v48  ;;  %vm1465_vm2 = vcmp.gt.f32.partialorder %v1459_v47, 0.5 }
 0x20d   : > { %vm1323_vm11 = vcmp.gt.f32.partialorder %v1317_v49, 0.0  ;;  %v1329_v50 = vmul.f32 0.01, %v1317_v49 }
 0x20f   : > { %v1335_v51 = vsel %vm1323_vm11, %v1317_v49, %v1329_v50  ;;  %vm1888_vm11 = vcmask 125952  }
 0x210   : > { %v1253_v53 = vpop.f32.mrf.mxu2  ;;  %1385 = vmatmul.f32.gmra.mxu0 %v1335_v51  ;;  %1440 = vmatmul.f32.gmra.mxu1 %v1335_v51 }
 0x211   : > { %v1307_v54 = vadd.f32 %v1306_v52, %v1253_v53 }
 0x213   : > { %v1318_v55 = vadd.f32 %v2720_v17, %v1307_v54  ;;  %v1447_v17 = vld [vmem:[%s2887_s21] sm:$0xff] }
 0x215   : > { %vm1324_vm12 = vcmp.gt.f32.partialorder %v1318_v55, 0.0  ;;  %v1330_v56 = vmul.f32 0.01, %v1318_v55 }
 0x217   : > { %v1336_v57 = vsel %vm1324_vm12, %v1318_v55, %v1330_v56 }
 0x218   : > { %1388 = vmatmul.f32.vlgmr.msrb.gmra.mxu2 %v1336_v57  ;;  %1443 = vmatmul.f32.gmra.mxu1 %v1336_v57 }
 0x26d   : > { %v1374_v60 = vpop.f32.mrf.mxu0 }
 0x26e   : > { %v3144_v63 = vadd.f32 %v2721_v61, %v1374_v60 }
 0x275   : > { %v1377_v62 = vpop.f32.mrf.mxu0 }
 0x276   : > { %v3146_v0 = vadd.f32 %v2721_v61, %v1377_v62 }
 0x278   : > { %v2696_v1 = vpack.i.bf16 %v3146_v0, %v3144_v63 }
 0x27a   : > { %2697 = vperm.xlu1 %2695, %v2696_v1   ;;  %2686 = vperm.xlu0 %2684, %v2696_v1  }
 0x27d   : > { %v1380_v2 = vpop.f32.mrf.mxu0 }
 0x27e   : > { %v3150_v4 = vadd.f32 %v2721_v61, %v1380_v2 }
 0x285   : > { %v1383_v3 = vpop.f32.mrf.mxu0 }
 0x286   : > { %v3152_v5 = vadd.f32 %v2721_v61, %v1383_v3 }
 0x288   : > { %v2707_v6 = vpack.i.bf16 %v3152_v5, %v3150_v4 }
 0x28a   : > { %2708 = vperm.xlu2 %2706, %v2707_v6  }
 0x28d   : > { %v1386_v7 = vpop.f32.mrf.mxu0 }
 0x28e   : > { %v3157_v10 = vadd.f32 %v2721_v61, %v1386_v7 }
 0x292   : > { %2712 = vset.pattern.permute.xlu2 %v2852_v58 }
 0x293   : > { %2714 = vperm.xlu2 %2712, %v2707_v6  }
 0x29b   : > { %v1389_v9 = vpop.f32.mrf.mxu2  ;;  %2719 = vset.pattern.permute.xlu2 %v2853_v59 }
 0x29c   : > { %v3159_v11 = vadd.f32 %v2721_v61, %v1389_v9  ;;  %1658 = vperm.xlu2 %2719, %v1452_v8  }
 0x29e   : > { %v2701_v12 = vpack.i.bf16 %v3159_v11, %v3157_v10 }
 0x2a0   : > { %2702 = vperm.xlu1 %2695, %v2701_v12   ;;  %2691 = vperm.xlu0 %2684, %v2701_v12  }
 0x2a4   : > { %1648 = vperm.xlu2 %2719, %v1450_v13  }
 0x2a8   : > { %2718 = vset.pattern.permute.xlu1 %v2853_v59 }
 0x2a9   : > { %1653 = vperm.xlu1 %2718, %v1451_v14  }
 0x2ac   : > { %1638 = vperm.xlu2 %2719, %v1448_v15  }
 0x2b1   : > { %1643 = vperm.xlu1 %2718, %v1449_v16  }
 0x2b9   : > { %1633 = vperm.xlu1 %2718, %v1447_v17  }
 0x2e4   : > { %v2709_v18 = vpop.permute.xlu2 %2708 }
 0x2e5   : > { %v2711_v26 = vunpack.i.h.bf16 %v2709_v18  ;;  %v2710_v33 = vunpack.i.l.bf16 %v2709_v18 }
 0x2e7   : > { %v1499_v40 = vsel %vm3172_vm13, %v2711_v26, -1e+30  ;;  %v1498_v42 = vsel %vm3176_vm14, %v2710_v33, -1e+30 }
 0x2e8   : > { %v1505_v50 = vsel %vm1112_vm5, %v1499_v40, -inf  ;;  %v1504_v51 = vsel %vm1112_vm5, %v1498_v42, -inf }
 0x2e9   : > { %v1511_v30 = vmax.f32 %v1504_v51, %v1505_v50 }
 0x2ec   : > { %v2698_v31 = vpop.permute.xlu1 %2697  ;;  %v2687_v34 = vpop.permute.xlu0 %2686 }
 0x2ed   : > { %v2715_v36 = vpop.permute.xlu2 %2714  ;;  %v2700_v37 = vunpack.i.h.bf16 %v2698_v31  ;;  %v2699_v38 = vunpack.i.l.bf16 %v2698_v31  ;;  %v2689_v41 = vunpack.i.h.bf16 %v2687_v34  ;;  %v2688_v43 = vunpack.i.l.bf16 %v2687_v34 }
 0x2ee   : > { %1697 = vxpose.xlu1.c.b16.start [1/3] (short) (narrow) %v3069_v25, 16  ;;  %v2717_v44 = vunpack.i.h.bf16 %v2715_v36  ;;  %v2716_v45 = vunpack.i.l.bf16 %v2715_v36 }
 0x2ef   : > { %v1544_v48 = vsel %vm1461_vm0, %v2700_v37, -1e+30  ;;  %v1543_v49 = vsel %vm1460_vm15, %v2699_v38, -1e+30  ;;  %v1497_v52 = vsel %vm1461_vm0, %v2689_v41, -1e+30 }
 0x2f0   : > { %v1496_v53 = vsel %vm1460_vm15, %v2688_v43, -1e+30  ;;  %v1546_v54 = vsel %vm3172_vm13, %v2717_v44, -1e+30  ;;  %v1545_v55 = vsel %vm3176_vm14, %v2716_v45, -1e+30 }
 0x2f1   : > { %v1550_v56 = vsel %vm1112_vm5, %v1544_v48, -inf  ;;  %v1549_v57 = vsel %vm1112_vm5, %v1543_v49, -inf  ;;  %v1503_v3 = vsel %vm1112_vm5, %v1497_v52, -inf  ;;  %v1502_v6 = vsel %vm1112_vm5, %v1496_v53, -inf }
 0x2f2   : > { %v1552_v7 = vsel %vm1112_vm5, %v1546_v54, -inf  ;;  %v1551_v8 = vsel %vm1112_vm5, %v1545_v55, -inf }
 0x2f3   : > { %v1558_v26 = vmax.f32 %v1551_v8, %v1552_v7 }
 0x2f6   : > { %v1659_v53 = vpop.permute.xlu2 %1658 }
 0x2fe   : > { %1698 = vxpose.xlu1.c.b16.cont [2/3] (short) (narrow) %v3080_v28, 16 }
 0x30e   : > { %1699 = vxpose.xlu1.c.b16.end [3/3] (short) (narrow) %v3073_v27, 16 }
 0x312   : > { %v2703_v59 = vpop.permute.xlu1 %2702  ;;  %v2692_v60 = vpop.permute.xlu0 %2691 }
 0x313   : > { %v2705_v61 = vunpack.i.h.bf16 %v2703_v59  ;;  %v2704_v62 = vunpack.i.l.bf16 %v2703_v59  ;;  %v2694_v1 = vunpack.i.h.bf16 %v2692_v60  ;;  %v2693_v2 = vunpack.i.l.bf16 %v2692_v60  ;;  %v2723_v59 = vld [vmem:[%s1006_s1] ss:$0 sm:$0xff]  ;;  %s3414_s1 = sld [smem:[#allocation16_spill]] (!%p2580_p5) }
 0x315   : > { %v1548_v9 = vsel %vm1465_vm2, %v2705_v61, -1e+30  ;;  %v1547_v12 = vsel %vm3194_vm1, %v2704_v62, -1e+30  ;;  %v1501_v13 = vsel %vm1465_vm2, %v2694_v1, -1e+30 }
 0x316   : > { %v1555_v14 = vsel %vm1112_vm5, %v1548_v9, -inf  ;;  %v1553_v15 = vsel %vm1112_vm5, %v1547_v12, -inf  ;;  %v1508_v16 = vsel %vm1112_vm5, %v1501_v13, -inf  ;;  %v1500_v17 = vsel %vm3194_vm1, %v2693_v2, -1e+30 }
 0x317   : > { %v1556_v18 = vmax.f32 %v1550_v56, %v1555_v14  ;;  %v1554_v19 = vmax.f32 %v1549_v57, %v1553_v15  ;;  %v1509_v20 = vmax.f32 %v1503_v3, %v1508_v16  ;;  %v1506_v21 = vsel %vm1112_vm5, %v1500_v17, -inf  ;;  %v1649_v56 = vpop.permute.xlu2 %1648 }
 0x318   : > { %v1507_v24 = vmax.f32 %v1502_v6, %v1506_v21  ;;  %v1664_v62 = vmul.f32 %v2723_v59, %v1649_v56  ;;  %v1666_v3 = vmul.f32 %v2723_v59, %v1659_v53 }
 0x319   : > { %v1557_v29 = vmax.f32 %v1554_v19, %v1556_v18 }
 0x31a   : > { %v1510_v31 = vmax.f32 %v1507_v24, %v1509_v20  ;;  %v1670_v12 = vadd.f32 %v1664_v62, %v3152_v5  ;;  %v1672_v16 = vadd.f32 %v1666_v3, %v3159_v11  ;;  %v1429_v3 = vpop.f32.mrf.mxu1 }
 0x31b   : > { %v1559_v32 = vmax.f32 %v1557_v29, %v1558_v26  ;;  %v1654_v54 = vpop.permute.xlu1 %1653 }
 0x31c   : > { %v1512_v33 = vmax.f32 %v1510_v31, %v1511_v30  ;;  %v1665_v60 = vmul.f32 %v2723_v59, %v1654_v54 }
 0x31d   : > { %v1560_v34 = vrot.slane %v1559_v32, 4 }
 0x31e   : > { %v1513_v35 = vrot.slane %v1512_v33, 4  ;;  %v1671_v2 = vadd.f32 %v1665_v60, %v3157_v10 }
 0x31f   : > { %v1561_v36 = vmax.f32 %v1559_v32, %v1560_v34  ;;  %v1639_v1 = vpop.permute.xlu2 %1638 }
 0x320   : > { %v1514_v37 = vmax.f32 %v1512_v33, %v1513_v35  ;;  %v1662_v9 = vmul.f32 %v2723_v59, %v1639_v1 }
 0x321   : > { %v1562_v38 = vrot.slane %v1561_v36, 2 }
 0x322   : > { %v1515_v39 = vrot.slane %v1514_v37, 2  ;;  %v1668_v19 = vadd.f32 %v1662_v9, %v3146_v0 }
 0x323   : > { %v1563_v40 = vmax.f32 %v1561_v36, %v1562_v38  ;;  %v1644_v58 = vpop.permute.xlu1 %1643 }
 0x324   : > { %v1516_v41 = vmax.f32 %v1514_v37, %v1515_v39  ;;  %v1663_v6 = vmul.f32 %v2723_v59, %v1644_v58 }
 0x325   : > { %v1564_v42 = vrot.slane %v1563_v40, 1 }
 0x326   : > { %v1517_v43 = vrot.slane %v1516_v41, 1  ;;  %v1669_v14 = vadd.f32 %v1663_v6, %v3150_v4  ;;  %v1432_v6 = vpop.f32.mrf.mxu1 }
 0x327   : > { %v1565_v44 = vmax.f32 %v1563_v40, %v1564_v42 }
 0x328   : > { %v1518_v45 = vmax.f32 %v1516_v41, %v1517_v43  ;;  %v1771_v43 = vld [vmem:[%s2912_s14] sm:$0x3] }
 0x329   : > { %2570 = vmatpush.msk.msra.mxu0 %vm1791_vm8, %v1771_v43 }
 0x32a   : > { %v1567_v46 = vsel %vm1566_vm3, %v1518_v45, %v1565_v44 }
 0x32b   : > { %1568 = vxpose.xlu0.b32.start.end [1/1] (short) (narrow) %v1567_v46, 16  ;;  %v1634_v7 = vpop.permute.xlu1 %1633 }
 0x32c   : > { %v1661_v13 = vmul.f32 %v2723_v59, %v1634_v7 }
 0x32e   : > { %v1667_v10 = vadd.f32 %v1661_v13, %v3144_v63 }
 0x39a   : > { %v3227_v38 = vpop.trf.xlu1 }
 0x3cf   : > { %v1584_v47 = vpop.trf.xlu0 }
 0x3d7   : > { %v1585_v48 = vpop.trf.xlu0 }
 0x3d8   : > { %v1600_v49 = vpack.c.bf16 %v1585_v48, %v1584_v47 }
 0x3da   : > { %v1602_v50 = vsel %vm1122_vm4, %v1600_v49, 0 }
 0x3db   : > { %1611 = vmatpush.bf16.msra.mxu2 %v1602_v50 }
 0x3de   : > { %2563 = vmatmul.msk.bf16.vlgmr.msra.gmra.mxu2 %vm1112_vm5, %v3069_v25 }
 0x3ee   : > { %2564 = vmatmul.msk.bf16.gmra.mxu2 %vm1112_vm5, %v3080_v28 }
 0x3fe   : > { %2565 = vmatmul.msk.bf16.gmra.mxu2 %vm1112_vm5, %v3073_v27 }
 0x461   : > { %v1613_v51 = vpop.f32.mrf.mxu2 }
 0x462   : > { %v1673_v30 = vsub.f32 %v1667_v10, %v1613_v51 }
 0x464   : > { %v1679_v4 = vmul.f32 1.442695, %v1673_v30 }
 0x469   : > { %v1615_v52 = vpop.f32.mrf.mxu2 }
 0x46a   : > { %v1674_v24 = vsub.f32 %v1668_v19, %v1615_v52 }
 0x46c   : > { %v1681_v31 = vmul.f32 1.442695, %v1674_v24 }
 0x471   : > { %v1618_v55 = vpop.f32.mrf.mxu2 }
 0x472   : > { %v1675_v20 = vsub.f32 %v1669_v14, %v1618_v55 }
 0x474   : > { %v1683_v5 = vmul.f32 1.442695, %v1675_v20 }
 0x479   : > { %v1620_v57 = vpop.f32.mrf.mxu2 }
 0x47a   : > { %v1676_v15 = vsub.f32 %v1670_v12, %v1620_v57 }
 0x47c   : > { %v1685_v26 = vmul.f32 1.442695, %v1676_v15  ;;  %v1856_v15 = vld [vmem:[%s3402_s11 + $0x18] sm:$0xff] }
 0x47d   : > { %1876 = vmatpush.msrb.mxu2 %v1856_v15 }
 0x481   : > { %v1623_v61 = vpop.f32.mrf.mxu2 }
 0x482   : > { %v1677_v8 = vsub.f32 %v1671_v2, %v1623_v61 }
 0x484   : > { %v1687_v17 = vmul.f32 1.442695, %v1677_v8  ;;  %v1435_v8 = vpop.f32.mrf.mxu1 }
 0x486   : > { %2726 = vpow2.f32 %v1687_v17 }
 0x489   : > { %v1625_v18 = vpop.f32.mrf.mxu2 }
 0x48a   : > { %v1678_v21 = vsub.f32 %v1672_v16, %v1625_v18  ;;  %v1855_v16 = vld [vmem:[%s3402_s11 + $0x10] sm:$0xff]  ;;  %v1854_v18 = vld [vmem:[%s3402_s11 + $0x8] sm:$0xff] }
 0x48b   : > { %1877 = vmatpush.msrb.mxu2 %v1855_v16 }
 0x48c   : > { %v1689_v29 = vmul.f32 1.442695, %v1678_v21  ;;  %v2727_v11 = vpop.eup %2726  ;;  %v1438_v12 = vpop.f32.mrf.mxu1  ;;  %v2722_v21 = vld [vmem:[%s1003_s28] ss:$0 sm:$0xff]  ;;  %s3413_s28 = sld [smem:[#allocation15_spill]] (!%p2580_p5) }
 0x48d   : > { %1878 = vmatpush.msrb.mxu2 %v1854_v18 }
 0x48e   : > { %2728 = vpow2.f32 %v1689_v29  ;;  %v1439_v29 = vadd.f32 %v2722_v21, %v1438_v12 }
 0x48f   : > { %2730 = vpow2.f32 %v1685_v26 }
 0x490   : > { %2732 = vpow2.f32 %v1683_v5 }
 0x491   : > { %2734 = vpow2.f32 %v1681_v31  ;;  %v1436_v31 = vadd.f32 %v2722_v21, %v1435_v8 }
 0x492   : > { %2736 = vpow2.f32 %v1679_v4 }
 0x494   : > { %v2729_v32 = vpop.eup %2728  ;;  %v1441_v17 = vpop.f32.mrf.mxu1 }
 0x495   : > { %v1693_v33 = vpack.c.bf16 %v2729_v32, %v2727_v11  ;;  %v2731_v0 = vpop.eup %2730  ;;  %v1442_v10 = vadd.f32 %v2722_v21, %v1441_v17 }
 0x496   : > { %v2733_v34 = vpop.eup %2732 }
 0x497   : > { %1722 = vmatpush.bf16.msrb.mxu3 %v1693_v33  ;;  %v1692_v63 = vpack.c.bf16 %v2731_v0, %v2733_v34  ;;  %v2735_v35 = vpop.eup %2734 }
 0x498   : > { %v2737_v36 = vpop.eup %2736 }
 0x499   : > { %v1691_v37 = vpack.c.bf16 %v2735_v35, %v2737_v36 }
 0x49b   : > { %1723 = vmatpush.bf16.msrb.mxu3 %v1692_v63 }
 0x49c   : > { %v1444_v20 = vpop.f32.mrf.mxu1 }
 0x49d   : > { %v1445_v24 = vadd.f32 %v2722_v21, %v1444_v20 }
 0x49f   : > { %1724 = vmatpush.bf16.msrb.mxu3 %v1691_v37  ;;  %v1853_v37 = vld [vmem:[%s3402_s11] sm:$0xff] }
 0x4a0   : > { %1879 = vmatpush.msrb.mxu2 %v1853_v37 }
 0x4a2   : > { %2566 = vmatmul.msk.bf16.vlgmr.msrb.gmra.mxu3 %vm1713_vm7, %v3227_v38 }
 0x525   : > { %v1726_v39 = vpop.f32.mrf.mxu3 }
 0x52d   : > { %v1728_v40 = vpop.f32.mrf.mxu3 }
 0x52e   : > { %v1731_v41 = vpack.c.bf16 %v1728_v40, %v1726_v39 }
 0x530   : > { %v1733_v42 = vsel %vm1122_vm4, %v1731_v41, 0  ;;  %v2854_v41 = vmov 12.0  }
 0x531   : > { %1742 = vmatpush.bf16.msra.mxu3 %v1733_v42 }
 0x534   : > { %2567 = vmatmul.msk.bf16.vlgmr.msra.gmra.mxu3 %vm1112_vm5, %v3069_v25 }
 0x544   : > { %2568 = vmatmul.msk.bf16.gmra.mxu3 %vm1112_vm5, %v3080_v28 }
 0x554   : > { %2569 = vmatmul.msk.bf16.gmra.mxu3 %vm1112_vm5, %v3073_v27 }
 0x5b7   : > { %v1744_v44 = vpop.f32.mrf.mxu3 }
 0x5b8   : > { %v1745_v45 = vadd.f32 1e-10, %v1744_v44 }
 0x5ba   : > { %2738 = vrcp.f32 %v1745_v45 }
 0x5bf   : > { %v1746_v46 = vpop.f32.mrf.mxu3 }
 0x5c0   : > { %v2739_v47 = vpop.eup %2738  ;;  %v1747_v48 = vadd.f32 1e-10, %v1746_v46 }
 0x5c1   : > { %v1765_v49 = vmul.f32 %v2739_v47, %v2737_v36 }
 0x5c2   : > { %2740 = vrcp.f32 %v1747_v48 }
 0x5c3   : > { %2571 = vmatmul.msk.f32.vlgmr.msra.gmra.mxu0 %vm1772_vm9, %v1765_v49 }
 0x5c7   : > { %v1749_v25 = vpop.f32.mrf.mxu3 }
 0x5c8   : > { %v2741_v28 = vpop.eup %2740  ;;  %v1750_v50 = vadd.f32 1e-10, %v1749_v25 }
 0x5c9   : > { %v1766_v51 = vmul.f32 %v2741_v28, %v2735_v35 }
 0x5ca   : > { %2742 = vrcp.f32 %v1750_v50 }
 0x5cb   : > { %2572 = vmatmul.msk.f32.gmra.mxu0 %vm1772_vm9, %v1766_v51 }
 0x5cf   : > { %v1751_v27 = vpop.f32.mrf.mxu3 }
 0x5d0   : > { %v2743_v52 = vpop.eup %2742  ;;  %v1752_v53 = vadd.f32 1e-10, %v1751_v27 }
 0x5d1   : > { %v1767_v54 = vmul.f32 %v2743_v52, %v2733_v34 }
 0x5d2   : > { %2744 = vrcp.f32 %v1752_v53 }
 0x5d3   : > { %2573 = vmatmul.msk.f32.gmra.mxu0 %vm1772_vm9, %v1767_v54 }
 0x5d7   : > { %v1754_v55 = vpop.f32.mrf.mxu3 }
 0x5d8   : > { %v2745_v56 = vpop.eup %2744  ;;  %v1755_v57 = vadd.f32 1e-10, %v1754_v55 }
 0x5d9   : > { %v1768_v58 = vmul.f32 %v2745_v56, %v2731_v0  ;;  %v1430_v0 = vadd.f32 %v2722_v21, %v1429_v3 }
 0x5da   : > { %2746 = vrcp.f32 %v1755_v57 }
 0x5db   : > { %2574 = vmatmul.msk.f32.gmra.mxu0 %vm1772_vm9, %v1768_v58 }
 0x5df   : > { %v1756_v59 = vpop.f32.mrf.mxu3 }
 0x5e0   : > { %v2747_v60 = vpop.eup %2746  ;;  %v1757_v61 = vadd.f32 1e-10, %v1756_v59 }
 0x5e1   : > { %v1769_v62 = vmul.f32 %v2747_v60, %v2727_v11 }
 0x5e2   : > { %2748 = vrcp.f32 %v1757_v61 }
 0x5e3   : > { %2575 = vmatmul.msk.f32.gmra.mxu0 %vm1772_vm9, %v1769_v62  ;;  %2750 = vrcp.f32 %v2854_v41 }
 0x5e8   : > { %v2749_v1 = vpop.eup %2748 }
 0x5e9   : > { %v1770_v2 = vmul.f32 %v2749_v1, %v2729_v32  ;;  %v1433_v32 = vadd.f32 %v2722_v21, %v1432_v6  ;;  %v2751_v43 = vpop.eup %2750 }
 0x5ea   : > { %v1898_v45 = vmul.f32 12.0, %v2751_v43  ;;  %vm1902_vm12 = vweird.f32 %v2751_v43 }
 0x5eb   : > { %2576 = vmatmul.msk.f32.gmra.mxu0 %vm1772_vm9, %v1770_v2 }
 0x5ec   : > { %v1899_v49 = vsub.f32 1.0, %v1898_v45 }
 0x5ee   : > { %v1900_v50 = vmul.f32 %v2751_v43, %v1899_v49 }
 0x5f0   : > { %v1901_v52 = vadd.f32 %v2751_v43, %v1900_v50 }
 0x640   : > { %v1812_v7 = vpop.f32.mrf.mxu0 }
 0x641   : > { %v1830_v35 = vmul.f32 %v1812_v7, %v1430_v0 }
 0x648   : > { %v1815_v9 = vpop.f32.mrf.mxu0 }
 0x649   : > { %v1831_v34 = vmul.f32 %v1815_v9, %v1433_v32 }
 0x64b   : > { %v1836_v36 = vpack.c.bf16 %v1831_v34, %v1830_v35 }
 0x650   : > { %v1818_v13 = vpop.f32.mrf.mxu0 }
 0x651   : > { %v1832_v33 = vmul.f32 %v1818_v13, %v1436_v31 }
 0x658   : > { %v1821_v14 = vpop.f32.mrf.mxu0 }
 0x659   : > { %v1833_v4 = vmul.f32 %v1821_v14, %v1439_v29 }
 0x65b   : > { %v1837_v63 = vpack.c.bf16 %v1833_v4, %v1832_v33 }
 0x660   : > { %v1824_v19 = vpop.f32.mrf.mxu0 }
 0x661   : > { %v1834_v30 = vmul.f32 %v1824_v19, %v1442_v10  ;;  %v2724_v19 = vld [vmem:[%s1009_s2] ss:$0 sm:$0xff]  ;;  %s3415_s2 = sld [smem:[#allocation17_spill]] (!%p2580_p5) }
 0x668   : > { %v1827_v26 = vpop.f32.mrf.mxu0 }
 0x669   : > { %v1835_v5 = vmul.f32 %v1827_v26, %v1445_v24  ;;  %v2725_v24 = vld [vmem:[%s1012_s7] ss:$0 sm:$0xff]  ;;  %s3406_s7 = sld [smem:[#allocation6_spill]] (!%p2580_p5) }
 0x66b   : > { %v1838_v11 = vpack.c.bf16 %v1835_v5, %v1834_v30 }
 0x66d   : > { %1844 = vmatpush.bf16.msrb.mxu1 %v1838_v11 }
 0x66f   : > { %s3407_s0 = smov (!%p2580_p5), %s3406_s7 }
 0x671   : > { %1845 = vmatpush.bf16.msrb.mxu1 %v1837_v63 }
 0x675   : > { %1846 = vmatpush.bf16.msrb.mxu1 %v1836_v36 }
 0x678   : > { %2577 = vmatmul.msk.bf16.vlgmr.msrb.gmra.mxu1 %vm1713_vm7, %v3227_v38 }
 0x6f5   : > { %v1848_v39 = vpop.f32.mrf.mxu1 }
 0x6f6   : > { %2578 = vmatmul.msk.f32.vlgmr.msrb.gmra.mxu2 %vm1857_vm10, %v1848_v39 }
 0x6fd   : > { %v1850_v40 = vpop.f32.mrf.mxu1 }
 0x6fe   : > { %2579 = vmatmul.msk.f32.gmra.mxu2 %vm1857_vm10, %v1850_v40 }
 0x779   : > { %v1881_v42 = vpop.f32.mrf.mxu2 }
 0x77a   : > { %v1882_v44 = vadd.f32 %v1881_v42, %v3062_v22  ;;  %v1903_v22 = vsel %vm1902_vm12, %v2751_v43, %v1901_v52 }
 0x77c   : > { %v1887_v47 = vsel %vm1202_vm6, %v1882_v44, 0.0 }
 0x781   : > { %v1884_v46 = vpop.f32.mrf.mxu2 }
 0x782   : > { %v1885_v38 = vadd.f32 %v1884_v46, %v3064_v23 }
 0x784   : > { %v1889_v48 = vsel %vm1888_vm11, %v1885_v38, 0.0 }
 0x785   : > { %v1890_v25 = vadd.f32 %v1889_v48, %v1887_v47 }
 0x787   : > { %v1891_v28 = vrot.slane %v1890_v25, 4 }
 0x789   : > { %v1892_v51 = vadd.f32 %v1891_v28, %v1890_v25 }
 0x78b   : > { %v1893_v27 = vrot.slane %v1892_v51, 2 }
 0x78d   : > { %v1894_v53 = vadd.f32 %v1893_v27, %v1892_v51 }
 0x78f   : > { %v1895_v54 = vrot.slane %v1894_v53, 1 }
 0x791   : > { %v1896_v55 = vadd.f32 %v1895_v54, %v1894_v53 }
 0x793   : > { %v1904_v56 = vmul.f32 %v1903_v22, %v1896_v55 }
 0x795   : > { %v1905_v57 = vsub.f32 %v1882_v44, %v1904_v56  ;;  %v1906_v58 = vsub.f32 %v1885_v38, %v1904_v56 }
 0x797   : > { %v1907_v23 = vmul.f32 %v1905_v57, %v1905_v57  ;;  %v1908_v59 = vmul.f32 %v1906_v58, %v1906_v58 }
 0x799   : > { %v1909_v60 = vsel %vm1202_vm6, %v1907_v23, 0.0  ;;  %v1910_v61 = vsel %vm1888_vm11, %v1908_v59, 0.0 }
 0x79a   : > { %v1911_v62 = vadd.f32 %v1910_v61, %v1909_v60 }
 0x79c   : > { %v1912_v1 = vrot.slane %v1911_v62, 4 }
 0x79e   : > { %v1913_v2 = vadd.f32 %v1912_v1, %v1911_v62 }
 0x7a0   : > { %v1914_v3 = vrot.slane %v1913_v2, 2 }
 0x7a2   : > { %v1915_v6 = vadd.f32 %v1914_v3, %v1913_v2 }
 0x7a4   : > { %v1916_v7 = vrot.slane %v1915_v6, 1 }
 0x7a6   : > { %v1917_v8 = vadd.f32 %v1916_v7, %v1915_v6 }
 0x7a8   : > { %v1918_v9 = vmul.f32 %v1917_v8, %v1903_v22 }
 0x7aa   : > { %v1919_v12 = vadd.f32 1e-05, %v1918_v9 }
 0x7ac   : > { %2752 = vrsqrt.f32 %v1919_v12  ;;  %vm1926_vm14 = vweird.f32 %v1919_v12 }
 0x7b2   : > { %v2753_v13 = vpop.eup %2752 }
 0x7b3   : > { %v1921_v14 = vmul.f32 %v2753_v13, %v1919_v12  ;;  %vm1927_vm13 = vweird.f32 %v2753_v13 }
 0x7b4   : > { %vm1928_vm15 = vmor %vm1926_vm14, %vm1927_vm13 }
 0x7b5   : > { %v1922_v15 = vmul.f32 %v2753_v13, %v1921_v14 }
 0x7b7   : > { %v1923_v16 = vmul.f32 0.5, %v1922_v15 }
 0x7b9   : > { %v1924_v17 = vsub.f32 1.5, %v1923_v16 }
 0x7bb   : > { %v1925_v18 = vmul.f32 %v2753_v13, %v1924_v17 }
 0x7bd   : > { %v1929_v20 = vsel %vm1928_vm15, %v2753_v13, %v1925_v18 }
 0x7be   : > { %v1930_v21 = vmul.f32 %v1929_v20, %v1905_v57  ;;  %v1931_v10 = vmul.f32 %v1929_v20, %v1906_v58 }
 0x7c0   : > { %v1936_v26 = vmul.f32 %v2724_v19, %v1930_v21  ;;  %v1937_v29 = vmul.f32 %v2724_v19, %v1931_v10 }
 0x7c1   : > { %1949 = sbr.rel (%p2580_p5) target bundleno = 3412 (0xd54), region = 144 }
 0x7c2   : > { %v1942_v30 = vadd.f32 %v2725_v24, %v1936_v26  ;;  %v1943_v5 = vadd.f32 %v2725_v24, %v1937_v29 }
 0x7c4   : > { %1944 = vst.msk [vmem:[#allocation2] sm:$0xff] %vm1202_vm6, %v1942_v30 }
 0x7c5   : > { %1945 = vst.msk [vmem:[#allocation2 + $0x8] sm:$0xf] %vm1888_vm11, %v1943_v5 }
 0x7c6   : > { %v1951_v31 = vld [vmem:[%s3403_s15 + $0x8] sm:$0xff]  ;;  %v1950_v4 = vld [vmem:[%s3403_s15] sm:$0xff]  ;;  %v2006_v11 = vld [vmem:[%s3404_s16 + $0x78] sm:$0xff]  ;;  %v2855_v58 = vmov 0   ;;  %v2856_v15 = vmov 1   ;;  %vm2098_vm7 = vcmask 23552  }
 0x7c7   : > { %1976 = vmatpush.msra.mxu0 %v1951_v31  ;;  %2011 = vmatpush.msra.mxu1 %v2006_v11  ;;  %v2049_v32 = vld [vmem:[%s3405_s18 + $0x78] sm:$0xff]  ;;  %v2005_v33 = vld [vmem:[%s3404_s16 + $0x70] sm:$0xff]  ;;  %v2004_v34 = vld [vmem:[%s3404_s16 + $0x68] sm:$0xff]  ;;  %vm2100_vm11 = vcmask 19456  }
 0x7c8   : > { %v2048_v0 = vld [vmem:[%s3405_s18 + $0x70] sm:$0xff]  ;;  %2054 = vmatpush.msra.mxu2 %v2049_v32  ;;  %v2047_v63 = vld [vmem:[%s3405_s18 + $0x68] sm:$0xff]  ;;  %v2003_v35 = vld [vmem:[%s3404_s16 + $0x60] sm:$0xff]  ;;  %2767 = vset.pattern.permute.xlu2 %v2855_v58 }
 0x7c9   : > { %1977 = vmatpush.msra.mxu0 %v1950_v4  ;;  %2012 = vmatpush.msra.mxu1 %v2005_v33  ;;  %v2046_v36 = vld [vmem:[%s3405_s18 + $0x60] sm:$0xff]  ;;  %v2002_v37 = vld [vmem:[%s3404_s16 + $0x58] sm:$0xff]  ;;  %v2001_v40 = vld [vmem:[%s3404_s16 + $0x50] sm:$0xff] }
 0x7ca   : > { %2581 = vmatmul.msk.f32.vlgmr.msra.gmra.mxu0 %vm1202_vm6, %v1942_v30  ;;  %2055 = vmatpush.msra.mxu2 %v2048_v0  ;;  %v2045_v39 = vld [vmem:[%s3405_s18 + $0x58] sm:$0xff]  ;;  %v2044_v41 = vld [vmem:[%s3405_s18 + $0x50] sm:$0xff]  ;;  %v2000_v42 = vld [vmem:[%s3404_s16 + $0x48] sm:$0xff] }
 0x7cb   : > { %2013 = vmatpush.msra.mxu1 %v2004_v34  ;;  %v2043_v43 = vld [vmem:[%s3405_s18 + $0x48] sm:$0xff]  ;;  %v1999_v44 = vld [vmem:[%s3404_s16 + $0x40] sm:$0xff]  ;;  %v1998_v46 = vld [vmem:[%s3404_s16 + $0x38] sm:$0xff]  ;;  %2754 = vset.pattern.permute.xlu0 %v2855_v58 }
 0x7cc   : > { %2056 = vmatpush.msra.mxu2 %v2047_v63  ;;  %v2042_v45 = vld [vmem:[%s3405_s18 + $0x40] sm:$0xff]  ;;  %v2041_v38 = vld [vmem:[%s3405_s18 + $0x38] sm:$0xff]  ;;  %v1997_v47 = vld [vmem:[%s3404_s16 + $0x30] sm:$0xff] }
 0x7cd   : > { %2014 = vmatpush.msra.mxu1 %v2003_v35  ;;  %v2040_v48 = vld [vmem:[%s3405_s18 + $0x30] sm:$0xff]  ;;  %v1996_v49 = vld [vmem:[%s3404_s16 + $0x28] sm:$0xff]  ;;  %v1995_v28 = vld [vmem:[%s3404_s16 + $0x20] sm:$0xff] }
 0x7ce   : > { %2057 = vmatpush.msra.mxu2 %v2046_v36  ;;  %v2039_v25 = vld [vmem:[%s3405_s18 + $0x28] sm:$0xff]  ;;  %v2038_v50 = vld [vmem:[%s3405_s18 + $0x20] sm:$0xff]  ;;  %v1994_v51 = vld [vmem:[%s3404_s16 + $0x18] sm:$0xff] }
 0x7cf   : > { %2015 = vmatpush.msra.mxu1 %v2002_v37  ;;  %v2037_v27 = vld [vmem:[%s3405_s18 + $0x18] sm:$0xff]  ;;  %v1993_v52 = vld [vmem:[%s3404_s16 + $0x10] sm:$0xff]  ;;  %v1992_v54 = vld [vmem:[%s3404_s16 + $0x8] sm:$0xff] }
 0x7d0   : > { %2058 = vmatpush.msra.mxu2 %v2045_v39  ;;  %v2036_v53 = vld [vmem:[%s3405_s18 + $0x10] sm:$0xff]  ;;  %v2035_v22 = vld [vmem:[%s3405_s18 + $0x8] sm:$0xff]  ;;  %v1991_v55 = vld [vmem:[%s3404_s16] sm:$0xff] }
 0x7d1   : > { %2016 = vmatpush.msra.mxu1 %v2001_v40  ;;  %v2034_v56 = vld [vmem:[%s3405_s18] sm:$0xff]  ;;  %v2080_v57 = vld [vmem:[%s3406_s7 + $0x8] sm:$0xf]  ;;  %s3416_s7 = sld [smem:[#allocation14_spill]] }
 0x7d2   : > { %2582 = vmatmul.msk.f32.gmra.mxu0 %vm1202_vm6, %v1943_v5  ;;  %2059 = vmatpush.msra.mxu2 %v2044_v41  ;;  %v2769_v23 = vld [vmem:[%s3408_s22] ss:$0 sm:$0xff]  ;;  %v2078_v17 = vld [vmem:[%s3410_s26 + $0x4] sm:$0x3] }
 0x7d3   : > { %2017 = vmatpush.msra.mxu1 %v2000_v42  ;;  %2199 = vperm.xlu2 %2767, %v2080_v57   ;;  %v2770_v8 = vld [vmem:[%s3409_s23] ss:$0 sm:$0xff]  ;;  %v2083_v19 = vunpack.c.l.bf16 %v2078_v17 }
 0x7d4   : > { %2060 = vmatpush.msra.mxu2 %v2043_v43  ;;  %v2077_v16 = vld [vmem:[%s3410_s26] sm:$0xf] }
 0x7d5   : > { %2018 = vmatpush.msra.mxu1 %v1999_v44  ;;  %v2082_v18 = vunpack.c.l.bf16 %v2077_v16  ;;  %vm2085_vm2 = vcmp.gt.f32.partialorder %v2083_v19, 0.5 }
 0x7d6   : > { %2061 = vmatpush.msra.mxu2 %v2042_v45 }
 0x7d7   : > { %2019 = vmatpush.msra.mxu1 %v1998_v46  ;;  %vm3322_vm1 = vcmp.gt.f32.partialorder %v2082_v18, 0.5  ;;  %v2271_v18 = vld [vmem:[%s3414_s1] sm:$0x3] }
 0x7d8   : > { %2062 = vmatpush.msra.mxu2 %v2041_v38 }
 0x7d9   : > { %2020 = vmatpush.msra.mxu1 %v1997_v47 }
 0x7da   : > { %2063 = vmatpush.msra.mxu2 %v2040_v48 }
 0x7db   : > { %2021 = vmatpush.msra.mxu1 %v1996_v49  ;;  %v2079_v49 = vld [vmem:[%s3407_s0] sm:$0xff] }
 0x7dc   : > { %2064 = vmatpush.msra.mxu2 %v2039_v25  ;;  %v2585_v25 = vld [vmem:[%s3410_s26] sm:$0xf] }
 0x7dd   : > { %2022 = vmatpush.msra.mxu1 %v1995_v28  ;;  %v2608_v28 = vld [vmem:[%s3410_s26] sm:$0x30] }
 0x7de   : > { %2065 = vmatpush.msra.mxu2 %v2038_v50  ;;  %v2586_v50 = vor.u32 %v2608_v28, %v2585_v25 }
 0x7df   : > { %2023 = vmatpush.msra.mxu1 %v1994_v51  ;;  %v2857_v51 = vmov 65535  }
 0x7e0   : > { %2066 = vmatpush.msra.mxu2 %v2037_v27  ;;  %v2170_v27 = vsel %vm1566_vm3, 4294967295, %v2857_v51 }
 0x7e1   : > { %2024 = vmatpush.msra.mxu1 %v1993_v52 }
 0x7e2   : > { %2067 = vmatpush.msra.mxu2 %v2036_v53  ;;  %v2171_v53 = vsel %vm1791_vm8, %v2170_v27, 0 }
 0x7e3   : > { %2025 = vmatpush.msra.mxu1 %v1992_v54 }
 0x7e4   : > { %2068 = vmatpush.msra.mxu2 %v2035_v22 }
 0x7e5   : > { %2026 = vmatpush.msra.mxu1 %v1991_v55 }
 0x7e6   : > { %2069 = vmatpush.msra.mxu2 %v2034_v56  ;;  %v2772_v56 = vld [vmem:[%s3413_s28] ss:$0 sm:$0xff] }
 0x7f9   : > { %2214 = vxpose.xlu2.c.b16.start.end [1/1] (short) (narrow) %v2586_v50, 16 }
 0x847   : > { %v1979_v59 = vpop.f32.mrf.mxu0 }
 0x848   : > { %v1980_v60 = vadd.f32 %v2769_v23, %v1979_v59 }
 0x84a   : > { %vm1985_vm6 = vcmp.gt.f32.partialorder %v1980_v60, 0.0  ;;  %v1987_v61 = vmul.f32 0.01, %v1980_v60 }
 0x84c   : > { %v1989_v62 = vsel %vm1985_vm6, %v1980_v60, %v1987_v61 }
 0x84d   : > { %2027 = vmatmul.f32.vlgmr.msra.gmra.mxu1 %v1989_v62  ;;  %2070 = vmatmul.f32.vlgmr.msra.gmra.mxu2 %v1989_v62 }
 0x84f   : > { %v1982_v1 = vpop.f32.mrf.mxu0 }
 0x850   : > { %v1983_v2 = vadd.f32 %v2769_v23, %v1982_v1 }
 0x852   : > { %vm1986_vm0 = vcmp.gt.f32.partialorder %v1983_v2, 0.0  ;;  %v1988_v3 = vmul.f32 0.01, %v1983_v2 }
 0x854   : > { %v1990_v6 = vsel %vm1986_vm0, %v1983_v2, %v1988_v3 }
 0x855   : > { %2030 = vmatmul.f32.gmra.mxu1 %v1990_v6  ;;  %2073 = vmatmul.f32.gmra.mxu2 %v1990_v6 }
 0x8ca   : > { %v2028_v7 = vpop.f32.mrf.mxu1 }
 0x8cb   : > { %v3313_v12 = vadd.f32 %v2770_v8, %v2028_v7 }
 0x8d2   : > { %v2031_v9 = vpop.f32.mrf.mxu1 }
 0x8d3   : > { %v3315_v13 = vadd.f32 %v2770_v8, %v2031_v9 }
 0x8d5   : > { %v2755_v14 = vpack.i.bf16 %v3315_v13, %v3313_v12 }
 0x8d7   : > { %2756 = vperm.xlu0 %2754, %v2755_v14  }
 0x8df   : > { %2760 = vset.pattern.permute.xlu0 %v2856_v15 }
 0x8e0   : > { %2762 = vperm.xlu0 %2760, %v2755_v14  }
 0x8e8   : > { %2768 = vset.pattern.permute.xlu0 %v2855_v58 }
 0x949   : > { %v2757_v20 = vpop.permute.xlu0 %2756 }
 0x94a   : > { %v2759_v10 = vunpack.i.h.bf16 %v2757_v20  ;;  %v2758_v24 = vunpack.i.l.bf16 %v2757_v20 }
 0x94c   : > { %v2096_v26 = vsel %vm3322_vm1, %v2758_v24, -1e+30  ;;  %v2097_v29 = vsel %vm2085_vm2, %v2759_v10, -1e+30 }
 0x94d   : > { %v2099_v30 = vsel %vm2098_vm7, %v2096_v26, -inf  ;;  %v2101_v5 = vsel %vm2100_vm11, %v2097_v29, -inf }
 0x94e   : > { %v2102_v31 = vmax.f32 %v2099_v30, %v2101_v5  ;;  %v2326_v5 = vld [vmem:[%s3415_s2 + $0x18] sm:$0xff] }
 0x94f   : > { %2342 = vmatpush.msrb.mxu1 %v2326_v5 }
 0x950   : > { %v2103_v4 = vrot.slane %v2102_v31, 4 }
 0x952   : > { %v2763_v11 = vpop.permute.xlu0 %2762  ;;  %v2104_v0 = vmax.f32 %v2102_v31, %v2103_v4  ;;  %v2325_v31 = vld [vmem:[%s3415_s2 + $0x10] sm:$0xff]  ;;  %v2324_v4 = vld [vmem:[%s3415_s2 + $0x8] sm:$0xff] }
 0x953   : > { %v2765_v32 = vunpack.i.h.bf16 %v2763_v11  ;;  %v2764_v33 = vunpack.i.l.bf16 %v2763_v11  ;;  %2343 = vmatpush.msrb.mxu1 %v2325_v31  ;;  %v2071_v11 = vpop.f32.mrf.mxu2 }
 0x954   : > { %v2105_v39 = vrot.slane %v2104_v0, 2 }
 0x955   : > { %v2118_v34 = vsel %vm2085_vm2, %v2765_v32, -1e+30  ;;  %v2117_v63 = vsel %vm3322_vm1, %v2764_v33, -1e+30  ;;  %2344 = vmatpush.msrb.mxu1 %v2324_v4  ;;  %v2771_v33 = vld [vmem:[%s3416_s7] ss:$0 sm:$0xff] }
 0x956   : > { %v2120_v35 = vsel %vm2100_vm11, %v2118_v34, -inf  ;;  %v2119_v36 = vsel %vm2098_vm7, %v2117_v63, -inf  ;;  %v2106_v41 = vmax.f32 %v2104_v0, %v2105_v39  ;;  %v2072_v34 = vadd.f32 %v2771_v33, %v2071_v11 }
 0x957   : > { %v2121_v37 = vmax.f32 %v2119_v36, %v2120_v35 }
 0x958   : > { %v2107_v44 = vrot.slane %v2106_v41, 1 }
 0x959   : > { %v2122_v40 = vrot.slane %v2121_v37, 4 }
 0x95a   : > { %v2108_v38 = vmax.f32 %v2106_v41, %v2107_v44  ;;  %v2323_v41 = vld [vmem:[%s3415_s2] sm:$0xff] }
 0x95b   : > { %v2123_v42 = vmax.f32 %v2121_v37, %v2122_v40  ;;  %v2074_v0 = vpop.f32.mrf.mxu2  ;;  %2345 = vmatpush.msrb.mxu1 %v2323_v41 }
 0x95c   : > { %v2075_v63 = vadd.f32 %v2771_v33, %v2074_v0 }
 0x95d   : > { %v2124_v43 = vrot.slane %v2123_v42, 2 }
 0x95f   : > { %v2125_v45 = vmax.f32 %v2123_v42, %v2124_v43 }
 0x961   : > { %v2126_v46 = vrot.slane %v2125_v45, 1 }
 0x963   : > { %v2127_v47 = vmax.f32 %v2125_v45, %v2126_v46 }
 0x965   : > { %v2128_v48 = vsel %vm1566_vm3, %v2108_v38, %v2127_v47  ;;  %vm2350_vm3 = vcmask 124928  }
 0x966   : > { %2129 = vxpose.xlu1.b32.start.end [1/1] (short) (narrow) %v2128_v48, 8 }
 0x9b9   : > { %2766 = vset.pattern.permute.xlu1 %v2855_v58  ;;  %v2200_v58 = vpop.permute.xlu2 %2199 }
 0x9ba   : > { %v2203_v60 = vmul.f32 %v2772_v56, %v2200_v58 }
 0x9bc   : > { %v2205_v62 = vadd.f32 %v2203_v60, %v3315_v13 }
 0x9c0   : > { %2194 = vperm.xlu1 %2766, %v2079_v49  }
 0x9c1   : > { %v2222_v15 = vpop.trf.xlu2 }
 0xa0a   : > { %v2145_v52 = vpop.trf.xlu1 }
 0xa0b   : > { %v2161_v54 = vpack.c.bf16 %v2145_v52, %v2145_v52 }
 0xa0d   : > { %v2173_v22 = vand.u32 %v2171_v53, %v2161_v54 }
 0xa0f   : > { %2182 = vmatpush.bf16.msra.mxu3 %v2173_v22 }
 0xa12   : > { %2587 = vmatmul.msk.bf16.vlgmr.msra.gmra.mxu3 %vm2098_vm7, %v2586_v50 }
 0xa32   : > { %v2195_v55 = vpop.permute.xlu1 %2194 }
 0xa33   : > { %v2202_v57 = vmul.f32 %v2772_v56, %v2195_v55 }
 0xa35   : > { %v2204_v59 = vadd.f32 %v2202_v57, %v3313_v12 }
 0xa95   : > { %v2184_v23 = vpop.f32.mrf.mxu3 }
 0xa96   : > { %v2206_v61 = vsub.f32 %v2204_v59, %v2184_v23 }
 0xa98   : > { %v2208_v1 = vmul.f32 1.442695, %v2206_v61 }
 0xa9a   : > { %2773 = vpow2.f32 %v2208_v1 }
 0xa9d   : > { %v2186_v2 = vpop.f32.mrf.mxu3 }
 0xa9e   : > { %v2207_v3 = vsub.f32 %v2205_v62, %v2186_v2 }
 0xaa0   : > { %v2210_v6 = vmul.f32 1.442695, %v2207_v3  ;;  %v2774_v7 = vpop.eup %2773 }
 0xaa2   : > { %2775 = vpow2.f32 %v2210_v6 }
 0xaa8   : > { %v2776_v8 = vpop.eup %2775 }
 0xaa9   : > { %v2212_v9 = vpack.c.bf16 %v2776_v8, %v2774_v7 }
 0xaab   : > { %v2234_v14 = vsel %vm1122_vm4, %v2212_v9, 0 }
 0xaac   : > { %2243 = vmatpush.bf16.msrb.mxu0 %v2234_v14 }
 0xaaf   : > { %2588 = vmatmul.msk.bf16.vlgmr.msrb.gmra.mxu0 %vm1112_vm5, %v2222_v15 }
 0xab0   : > { %2590 = vmatpush.msk.msra.mxu0 %vm1791_vm8, %v2271_v18 }
 0xb2c   : > { %v2245_v12 = vpop.f32.mrf.mxu0 }
 0xb2d   : > { %v2249_v16 = vpack.c.bf16 %v2245_v12, %v2245_v12 }
 0xb2f   : > { %v2251_v17 = vand.u32 %v2249_v16, %v2171_v53 }
 0xb31   : > { %2260 = vmatpush.bf16.msrb.mxu3 %v2251_v17 }
 0xb34   : > { %v2247_v13 = vpop.f32.mrf.mxu0  ;;  %2589 = vmatmul.msk.bf16.vlgmr.msrb.gmra.mxu3 %vm2098_vm7, %v2586_v50 }
 0xbb7   : > { %v2262_v19 = vpop.f32.mrf.mxu3 }
 0xbb8   : > { %v2263_v20 = vadd.f32 1e-10, %v2262_v19 }
 0xbba   : > { %2777 = vrcp.f32 %v2263_v20 }
 0xbbf   : > { %v2264_v21 = vpop.f32.mrf.mxu3 }
 0xbc0   : > { %v2778_v10 = vpop.eup %2777  ;;  %v2265_v24 = vadd.f32 1e-10, %v2264_v21 }
 0xbc1   : > { %v2269_v26 = vmul.f32 %v2778_v10, %v2774_v7 }
 0xbc2   : > { %2779 = vrcp.f32 %v2265_v24 }
 0xbc3   : > { %2591 = vmatmul.msk.f32.vlgmr.msra.gmra.mxu0 %vm1772_vm9, %v2269_v26 }
 0xbc8   : > { %v2780_v29 = vpop.eup %2779 }
 0xbc9   : > { %v2270_v30 = vmul.f32 %v2780_v29, %v2776_v8 }
 0xbcb   : > { %2592 = vmatmul.msk.f32.gmra.mxu0 %vm1772_vm9, %v2270_v30 }
 0xc40   : > { %v2298_v32 = vpop.f32.mrf.mxu0 }
 0xc41   : > { %v2304_v36 = vmul.f32 %v2298_v32, %v2072_v34 }
 0xc48   : > { %v2301_v35 = vpop.f32.mrf.mxu0 }
 0xc49   : > { %v2305_v37 = vmul.f32 %v2301_v35, %v2075_v63 }
 0xc4b   : > { %v2306_v39 = vpack.c.bf16 %v2305_v37, %v2304_v36 }
 0xc4d   : > { %v2308_v40 = vsel %vm1122_vm4, %v2306_v39, 0 }
 0xc4e   : > { %2317 = vmatpush.bf16.msra.mxu3 %v2308_v40 }
 0xc51   : > { %2593 = vmatmul.msk.bf16.vlgmr.msra.gmra.mxu3 %vm1112_vm5, %v2222_v15 }
 0xcd4   : > { %v2319_v42 = vpop.f32.mrf.mxu3 }
 0xcd5   : > { %2594 = vmatmul.msk.f32.vlgmr.msrb.gmra.mxu1 %vm1857_vm10, %v2319_v42 }
 0xcdc   : > { %v2321_v43 = vpop.f32.mrf.mxu3 }
 0xd52   : > { %v2347_v44 = vpop.f32.mrf.mxu1 }
 0xd53   : > { %2351 = vst.msk [vmem:[#allocation3] sm:$0x7] %vm2350_vm3, %v2347_v44 }
 0xd54 PF: > { %p2632_p6 = scmp.eq.s32.totalorder %s3020_s10, 1  ;;  %s2858_s22 = smov [#allocation3]  }
 0xd55   : > { %s2358_s23 = sshll.u32 %s2858_s22, 4  ;;  %s2360_s28 = sshll.u32 %s3012_s19, 4  ;;  %s2359_s23 = int_to_ptr.vmem [resolvable:$true] %s2358_s23  ;;  %s2361_s28 = int_to_ptr.hbm [resolvable:$true] %s2360_s28 }
 0xd56   : > { %s2795_s1 = sshra.s32 %s2361_s28, 4  ;;  %s2801_s0 = scalar_lea.hbm %s3012_s19, 4  ;;  %s2796_s1 = int_to_ptr.hbm [resolvable:$true] %s2795_s1 }
 0xd57   : > { %s2797_s7 = scalar_lea.hbm %s2796_s1, 4  ;;  %p2802_p10 = scmp.lt.s32.totalorder %s2796_s1, %s3012_s19 }
 0xd58   : > { %p2798_p7 = scmp.ne.s32.totalorder %s2796_s1, %s2797_s7  ;;  %p2803_p11 = scmp.lt.s32.totalorder %s2801_s0, %s2797_s7 }
 0xd5a   : > { %p2799_p8 = pnand %p2798_p7, %p2632_p6  ;;  %p2804_p12 = por %p2803_p11, %p2802_p10 }
 0xd5c   : > { %p2800_p9 = pneg %p2799_p8 }
 0xd5e   : > { %p2805_p13 = pnand %p2804_p12, %p2800_p9 }
 0xd60   : > { %2808 = shalt.err (!%p2805_p13)
}
 0xd61   : > { %2629 = dma.vmem_to_hbm [thread:$0]  (%p2632_p6), %s2359_s23, 64, %s2361_s28, [#allocation4]  }
 0xd62   : > { %2814 = dma.done.wait (%p2632_p6), [#allocation4], 64  }
 0xd63   : > { %2816 = vsyncadd (%p2632_p6), [#allocation4], 4294967232 }
 0xd64 PF: > { %s3417_s22 = sld [smem:[#allocation18_spill]] }
 0xd6a   : > { %s70_s7 = sadd.s32 1, %s3417_s22  }
 0xd6b   : > { %p67_p0 = scmp.ge.s32.totalorder %s70_s7, 4  }
 0xd6d   :  { %69 = sbr.rel (!%p67_p0) target bundleno = 44 (0x2c), region = 224 }
 0xd72   :  { %2374 = vsyncpa [#allocation4], 1 }
 0xd73   :  { %2376 = vsyncpa [#allocation4 + $0x1], 1 }

</bundles_post_ra>
